<compile_context>
chip_gen: v6e
topology: v6e:2x2x1
jax: 0.10.0
libtpu: 0.0.40
codegen_flags: <defaults>
</compile_context>

<pallas_src>
import math

import jax
import jax.numpy as jnp
from jax.experimental import pallas as pl
from jax.experimental.pallas import tpu as pltpu


def _round_up(n, m):
    return ((n + m - 1) // m) * m


def _next_pow2(n):
    return 1 << (int(n) - 1).bit_length()


def _choose_tiling(batch, tb, *, align=256, bucket=True):
    """Pick (tile rows, padded batch, grid steps).

    * tiles aligned to `align` rows (256 = bf16 sublane pack x MXU M on
      v6e/v7x, also a multiple of 128 for v5e),
    * keep >= 2 grid steps when there is enough work so the "parallel" batch
      axis can be split across both v7x TensorCores,
    * optionally bucket the padded batch to a power of two so varying point
      counts reuse a small set of compiled shapes (no recompile churn).
    """
    tb = max(align, _round_up(tb, align))
    b_pad = _round_up(batch, align)
    if bucket:
        b_pad = max(align, _next_pow2(b_pad))
    tb_eff = min(tb, b_pad)
    if b_pad >= 2 * align and tb_eff >= b_pad:
        tb_eff = _round_up(b_pad // 2, align)      # >= 2 steps (v7x: 2 TCs)
    n_steps = -(-b_pad // tb_eff)
    b_pad = n_steps * tb_eff
    return tb_eff, b_pad, n_steps


# ---------------------------------------------------------------------------
# Pallas kernel: full MLP (Linear -> ReLU -> ... -> Linear) on one batch tile.
# ---------------------------------------------------------------------------
def _mlp_kernel(x_ref, w0_ref, b0_ref, w_hid_ref, b_hid_ref,
                w_out_ref, b_out_ref, o_ref):
    """Shapes (per tile):
      x_ref:     (tb, d_feat_pad)  bf16  per-point features (PE + extras)
      w0_ref:    (d_feat_pad, H)   bf16  first-layer weights (camera folded into b0)
      b0_ref:    (1, H)            f32   b_in + camera @ W_cam
      w_hid_ref: (nh, H, H)        bf16
      b_hid_ref: (nh, 1, H)        f32
      w_out_ref: (H, d_out_pad)    bf16  zero-padded to a 128-lane multiple
      b_out_ref: (1, d_out_pad)    f32
      o_ref:     (tb, d_out_pad)   f32
    """
    bf16 = jnp.bfloat16

    # First layer: bf16 x bf16 -> f32 accumulate on the MXU, then bias + ReLU.
    h = jnp.dot(x_ref[...], w0_ref[...], preferred_element_type=jnp.float32)
    h = jnp.maximum(h + b0_ref[...], 0.0)

    # Hidden layers (static unroll over a small fixed depth).
    for l in range(w_hid_ref.shape[0]):
        h = jnp.dot(h.astype(bf16), w_hid_ref[l],
                    preferred_element_type=jnp.float32)
        h = jnp.maximum(h + b_hid_ref[l], 0.0)

    # Output layer (no activation), lane-dense (d_out_pad = 128k) store.
    o = jnp.dot(h.astype(bf16), w_out_ref[...],
                preferred_element_type=jnp.float32)
    o_ref[...] = (o + b_out_ref[...]).astype(o_ref.dtype)


# ---------------------------------------------------------------------------
# Glue: positional encoding (camera handled separately via the bias fold).
# ---------------------------------------------------------------------------
def _positional_features(x, degree):
    """[xyz, sin(2^d*pi*xyz), cos(2^d*pi*xyz) for d, extras]  (no camera)."""
    xyz = x[:, :3]
    pe = [xyz]
    for d in range(degree):
        pe.append(jnp.sin((2.0 ** d) * math.pi * xyz))
        pe.append(jnp.cos((2.0 ** d) * math.pi * xyz))
    return jnp.concatenate(pe + [x[:, 3:]], axis=-1).astype(jnp.float32)


def semantic_predictor_forward(x, camera_features, params, *, degree=1,
                               tb=2048, bucket_batch=True):
    w_in, b_in, w_hid, b_hid, w_out, b_out = params
    B = x.shape[0]
    cam_dim = camera_features.shape[0]
    H = w_in.shape[1]
    d_out = w_out.shape[1]
    nh = w_hid.shape[0]
    assert H % 128 == 0, "hidden_dim must be a multiple of 128 lanes"
    assert nh >= 1, "need num_layers >= 3"
    assert degree >= 1, "degree >= 1 (matches the module default)"

    bf16 = jnp.bfloat16

    # ---- per-point features (PE + extras); camera folded into first bias.
    # NOTE: features are cast to bf16 before the first matmul (f32 MXU
    # accumulation); large-magnitude raw coords/extras lose a little precision
    # vs the f32 reference.
    feats = _positional_features(x.astype(jnp.float32), degree)    # (B, d_feat)
    d_feat = feats.shape[1]
    assert d_feat + cam_dim == w_in.shape[0]

    d_feat_pad = _round_up(d_feat, 16)           # bf16 sublane pack on w0 rows
    d_out_pad = _round_up(d_out, 128)            # lane-dense output stores

    # ---- pack parameters (single jnp.pad passes, one-off JAX glue). --------
    # The module's input layout is [PE(xyz), extras, camera]; camera occupies
    # the LAST cam_dim rows of w_in, and its row-constant contribution folds
    # into the first-layer bias.
    b0 = (b_in + camera_features.astype(jnp.float32) @ w_in[d_feat:])[None, :]
    w0 = jnp.pad(w_in[:d_feat], ((0, d_feat_pad - d_feat), (0, 0))).astype(bf16)
    w_hid_b = w_hid.astype(bf16)                                    # (nh, H, H)
    b_hid_b = b_hid[:, None, :].astype(jnp.float32)                 # (nh, 1, H)
    w_out_b = jnp.pad(w_out, ((0, 0), (0, d_out_pad - d_out))).astype(bf16)
    b_out_p = jnp.pad(b_out, (0, d_out_pad - d_out))[None, :].astype(jnp.float32)

    # ---- batch tiling: 256-aligned tiles, >=2 parallel steps, pow2 bucket. -
    tb_eff, B_pad, n_steps = _choose_tiling(B, tb, bucket=bucket_batch)

    # Compact bf16 rows, padded in a single pass (no f32 scratch slab).
    xf = jnp.pad(feats.astype(bf16),
                 ((0, B_pad - B), (0, d_feat_pad - d_feat)))

    # Advisory cost hint for the XLA scheduler.
    flops = 2 * B_pad * (d_feat_pad * H + nh * H * H + H * d_out_pad)
    bytes_accessed = (B_pad * d_feat_pad * 2 + B_pad * d_out_pad * 4
                      + (d_feat_pad * H + nh * H * H + H * d_out_pad) * 2
                      + (H + nh * H + d_out_pad) * 4)

    out = pl.pallas_call(
        _mlp_kernel,
        out_shape=jax.ShapeDtypeStruct((B_pad, d_out_pad), jnp.float32),
        grid_spec=pltpu.PrefetchScalarGridSpec(
            num_scalar_prefetch=0,
            grid=(n_steps,),
            in_specs=[
                pl.BlockSpec((tb_eff, d_feat_pad), lambda i: (i, 0)),   # feats
                pl.BlockSpec((d_feat_pad, H), lambda i: (0, 0)),        # W0
                pl.BlockSpec((1, H), lambda i: (0, 0)),                 # b0
                pl.BlockSpec((nh, H, H), lambda i: (0, 0, 0)),          # W_hid
                pl.BlockSpec((nh, 1, H), lambda i: (0, 0, 0)),          # b_hid
                pl.BlockSpec((H, d_out_pad), lambda i: (0, 0)),         # W_out
                pl.BlockSpec((1, d_out_pad), lambda i: (0, 0)),         # b_out
            ],
            out_specs=pl.BlockSpec((tb_eff, d_out_pad), lambda i: (i, 0)),
        ),
        compiler_params=pltpu.CompilerParams(
            dimension_semantics=("parallel",)),
        cost_estimate=pl.CostEstimate(
            flops=flops, transcendentals=0, bytes_accessed=bytes_accessed),
    )(xf, w0, b0, w_hid_b, b_hid_b, w_out_b, b_out_p)

    # If the consumer can take the padded (B_pad, d_out_pad) block, return
    # `out` directly and let the slice fuse downstream (saves one HBM pass).
    return out[:B, :d_out]


# ---------------------------------------------------------------------------
# Deterministic parameter init (shapes follow SemanticPredictor.__init__;
# weights stored pre-transposed as (in, out), i.e. y = x @ W + b).
# ---------------------------------------------------------------------------
def make_params(key, *, input_dim, hidden_dim, output_dim, num_layers):
    ks = jax.random.split(key, 2 * num_layers)

    def linear(kw, kb, fan_in, fan_out):
        bound = 1.0 / math.sqrt(fan_in)
        w = jax.random.uniform(kw, (fan_in, fan_out), jnp.float32, -bound, bound)
        b = jax.random.uniform(kb, (fan_out,), jnp.float32, -bound, bound)
        return w, b

    w_in, b_in = linear(ks[0], ks[1], input_dim, hidden_dim)
    hid_w, hid_b = [], []
    for l in range(num_layers - 2):
        w, b = linear(ks[2 + 2 * l], ks[3 + 2 * l], hidden_dim, hidden_dim)
        hid_w.append(w)
        hid_b.append(b)
    w_out, b_out = linear(ks[-2], ks[-1], hidden_dim, output_dim)
    return (w_in, b_in, jnp.stack(hid_w), jnp.stack(hid_b), w_out, b_out)


# ---------------------------------------------------------------------------
# Pure-JAX f32 reference (mirrors the PyTorch forward exactly).
# ---------------------------------------------------------------------------
def reference_forward(x, camera_features, params, *, degree):
    w_in, b_in, w_hid, b_hid, w_out, b_out = params
    feats = _positional_features(x.astype(jnp.float32), degree)
    cam = jnp.broadcast_to(camera_features.astype(jnp.float32)[None, :],
                           (x.shape[0], camera_features.shape[0]))
    feats = jnp.concatenate([feats, cam], axis=-1)
    h = jnp.maximum(feats @ w_in + b_in, 0.0)
    for l in range(w_hid.shape[0]):
        h = jnp.maximum(h @ w_hid[l] + b_hid[l], 0.0)
    return h @ w_out + b_out


if __name__ == "__main__":
    # Small config consistent with the module (module defaults are hidden=256,
    # num_layers=8 -- shrunk here for a quick self-test):
    #   degree=1, camera_dim=12, 6+1 extra per-point features
    #   => input_dim = 3*(2*1+1) + 12 + 6 + 1 = 28, per-point features = 16
    degree = 1
    camera_dim = 12
    hidden_dim = 128
    num_layers = 4
    output_dim = 8
    n_extra = 7                                   # the module's "+ 6 + 1"
    batch = 600                                   # not a tile multiple: exercises pad/bucket/slice
    input_dim = 3 * (2 * degree + 1) + camera_dim + n_extra    # = 28

    key = jax.random.PRNGKey(0)
    kx, kc, kp = jax.random.split(key, 3)
    x = jax.random.normal(kx, (batch, 3 + n_extra), jnp.float32)      # (600, 10)
    camera_features = jax.random.normal(kc, (camera_dim,), jnp.float32)

    params = make_params(kp, input_dim=input_dim, hidden_dim=hidden_dim,
                         output_dim=output_dim, num_layers=num_layers)

    out = semantic_predictor_forward(x, camera_features, params,
                                     degree=degree, tb=2048)
    out = jax.block_until_ready(out)

    ref = reference_forward(x, camera_features, params, degree=degree)
    assert out.shape == (batch, output_dim)
    # bf16 matmul operands (f32 accumulation) => loosened tolerance vs f32 ref.
    assert jnp.allclose(out, ref, atol=5e-2, rtol=5e-2), "mismatch vs reference"

    print("KERNEL_OK")
</pallas_src>

<mosaic_0001>
module attributes {stable_mosaic.version = 11 : i64} {
  func.func @_mlp_kernel(%arg0: i32, %arg1: memref<512x16xbf16, #tpu.memory_space<vmem>>, %arg2: memref<16x128xbf16, #tpu.memory_space<vmem>>, %arg3: memref<1x128xf32, #tpu.memory_space<vmem>>, %arg4: memref<2x128x128xbf16, #tpu.memory_space<vmem>>, %arg5: memref<2x1x128xf32, #tpu.memory_space<vmem>>, %arg6: memref<128x128xbf16, #tpu.memory_space<vmem>>, %arg7: memref<1x128xf32, #tpu.memory_space<vmem>>, %arg8: memref<512x128xf32, #tpu.memory_space<vmem>>) attributes {dimension_semantics = [#tpu.dimension_semantics<parallel>], iteration_bounds = array<i64: 2>, scalar_prefetch = 0 : i64, scratch_operands = 0 : i64, tpu.core_type = #tpu.core_type<tc>, window_params = [{transform_indices = @transform_0, window_bounds = array<i64: 512, 16>}, {pipeline_mode = #tpu.pipeline_mode<synchronous>, transform_indices = @transform_1, window_bounds = array<i64: 16, 128>}, {pipeline_mode = #tpu.pipeline_mode<synchronous>, transform_indices = @transform_2, window_bounds = array<i64: 1, 128>}, {pipeline_mode = #tpu.pipeline_mode<synchronous>, transform_indices = @transform_3, window_bounds = array<i64: 2, 128, 128>}, {pipeline_mode = #tpu.pipeline_mode<synchronous>, transform_indices = @transform_4, window_bounds = array<i64: 2, 1, 128>}, {pipeline_mode = #tpu.pipeline_mode<synchronous>, transform_indices = @transform_5, window_bounds = array<i64: 128, 128>}, {pipeline_mode = #tpu.pipeline_mode<synchronous>, transform_indices = @transform_6, window_bounds = array<i64: 1, 128>}, {transform_indices = @transform_7, window_bounds = array<i64: 512, 128>}]} {
    %c0 = arith.constant 0 : index
    %c0_0 = arith.constant 0 : index
    %0 = vector.load %arg1[%c0, %c0_0] : memref<512x16xbf16, #tpu.memory_space<vmem>>, vector<512x16xbf16>
    %c0_1 = arith.constant 0 : index
    %c0_2 = arith.constant 0 : index
    %1 = vector.load %arg2[%c0_1, %c0_2] : memref<16x128xbf16, #tpu.memory_space<vmem>>, vector<16x128xbf16>
    %cst = arith.constant dense<0.000000e+00> : vector<512x128xf32>
    %2 = tpu.matmul %0, %1, %cst {dimension_numbers = #tpu.dot_dimension_numbers<[1], [0], [0], [1], [0, 0, 1, 1], [], []>} : vector<512x16xbf16>, vector<16x128xbf16>, vector<512x128xf32> -> vector<512x128xf32>
    %c0_3 = arith.constant 0 : index
    %c0_4 = arith.constant 0 : index
    %3 = vector.load %arg3[%c0_3, %c0_4] : memref<1x128xf32, #tpu.memory_space<vmem>>, vector<1x128xf32>
    %4 = vector.broadcast %3 : vector<1x128xf32> to vector<512x128xf32>
    %5 = arith.addf %2, %4 : vector<512x128xf32>
    %cst_5 = arith.constant 0.000000e+00 : f32
    %6 = vector.broadcast %cst_5 : f32 to vector<512x128xf32>
    %7 = arith.maximumf %5, %6 : vector<512x128xf32>
    %8 = arith.truncf %7 : vector<512x128xf32> to vector<512x128xbf16>
    %c0_6 = arith.constant 0 : index
    %c0_7 = arith.constant 0 : index
    %c0_8 = arith.constant 0 : index
    %9 = vector.load %arg4[%c0_6, %c0_7, %c0_8] : memref<2x128x128xbf16, #tpu.memory_space<vmem>>, vector<1x128x128xbf16>
    %10 = vector.shape_cast %9 : vector<1x128x128xbf16> to vector<128x128xbf16>
    %cst_9 = arith.constant dense<0.000000e+00> : vector<512x128xf32>
    %11 = tpu.matmul %8, %10, %cst_9 {dimension_numbers = #tpu.dot_dimension_numbers<[1], [0], [0], [1], [0, 0, 1, 1], [], []>} : vector<512x128xbf16>, vector<128x128xbf16>, vector<512x128xf32> -> vector<512x128xf32>
    %c0_10 = arith.constant 0 : index
    %c0_11 = arith.constant 0 : index
    %c0_12 = arith.constant 0 : index
    %12 = vector.load %arg5[%c0_10, %c0_11, %c0_12] : memref<2x1x128xf32, #tpu.memory_space<vmem>>, vector<1x1x128xf32>
    %13 = vector.shape_cast %12 : vector<1x1x128xf32> to vector<1x128xf32>
    %14 = vector.broadcast %13 : vector<1x128xf32> to vector<512x128xf32>
    %15 = arith.addf %11, %14 : vector<512x128xf32>
    %cst_13 = arith.constant 0.000000e+00 : f32
    %16 = vector.broadcast %cst_13 : f32 to vector<512x128xf32>
    %17 = arith.maximumf %15, %16 : vector<512x128xf32>
    %18 = arith.truncf %17 : vector<512x128xf32> to vector<512x128xbf16>
    %c1 = arith.constant 1 : index
    %c0_14 = arith.constant 0 : index
    %c0_15 = arith.constant 0 : index
    %19 = vector.load %arg4[%c1, %c0_14, %c0_15] : memref<2x128x128xbf16, #tpu.memory_space<vmem>>, vector<1x128x128xbf16>
    %20 = vector.shape_cast %19 : vector<1x128x128xbf16> to vector<128x128xbf16>
    %cst_16 = arith.constant dense<0.000000e+00> : vector<512x128xf32>
    %21 = tpu.matmul %18, %20, %cst_16 {dimension_numbers = #tpu.dot_dimension_numbers<[1], [0], [0], [1], [0, 0, 1, 1], [], []>} : vector<512x128xbf16>, vector<128x128xbf16>, vector<512x128xf32> -> vector<512x128xf32>
    %c1_17 = arith.constant 1 : index
    %c0_18 = arith.constant 0 : index
    %c0_19 = arith.constant 0 : index
    %22 = vector.load %arg5[%c1_17, %c0_18, %c0_19] : memref<2x1x128xf32, #tpu.memory_space<vmem>>, vector<1x1x128xf32>
    %23 = vector.shape_cast %22 : vector<1x1x128xf32> to vector<1x128xf32>
    %24 = vector.broadcast %23 : vector<1x128xf32> to vector<512x128xf32>
    %25 = arith.addf %21, %24 : vector<512x128xf32>
    %cst_20 = arith.constant 0.000000e+00 : f32
    %26 = vector.broadcast %cst_20 : f32 to vector<512x128xf32>
    %27 = arith.maximumf %25, %26 : vector<512x128xf32>
    %28 = arith.truncf %27 : vector<512x128xf32> to vector<512x128xbf16>
    %c0_21 = arith.constant 0 : index
    %c0_22 = arith.constant 0 : index
    %29 = vector.load %arg6[%c0_21, %c0_22] : memref<128x128xbf16, #tpu.memory_space<vmem>>, vector<128x128xbf16>
    %cst_23 = arith.constant dense<0.000000e+00> : vector<512x128xf32>
    %30 = tpu.matmul %28, %29, %cst_23 {dimension_numbers = #tpu.dot_dimension_numbers<[1], [0], [0], [1], [0, 0, 1, 1], [], []>} : vector<512x128xbf16>, vector<128x128xbf16>, vector<512x128xf32> -> vector<512x128xf32>
    %c0_24 = arith.constant 0 : index
    %c0_25 = arith.constant 0 : index
    %31 = vector.load %arg7[%c0_24, %c0_25] : memref<1x128xf32, #tpu.memory_space<vmem>>, vector<1x128xf32>
    %32 = vector.broadcast %31 : vector<1x128xf32> to vector<512x128xf32>
    %33 = arith.addf %30, %32 : vector<512x128xf32>
    %c0_26 = arith.constant 0 : index
    %c0_27 = arith.constant 0 : index
    %34 = vector.load %arg8[%c0_26, %c0_27] : memref<512x128xf32, #tpu.memory_space<vmem>>, vector<512x128xf32>
    tpu.vector_store %arg8[%c0_26, %c0_27], %33 {strides = array<i32>} : memref<512x128xf32, #tpu.memory_space<vmem>>, vector<512x128xf32>,
    return
  }
  func.func @transform_0(%arg0: i32) -> (i32, i32) {
    %c0_i32 = arith.constant 0 : i32
    %c0_i32_0 = arith.constant 0 : i32
    return %arg0, %c0_i32 : i32, i32
  }
  func.func @transform_1(%arg0: i32) -> (i32, i32) {
    %c0_i32 = arith.constant 0 : i32
    %c0_i32_0 = arith.constant 0 : i32
    %c0_i32_1 = arith.constant 0 : i32
    return %c0_i32, %c0_i32_0 : i32, i32
  }
  func.func @transform_2(%arg0: i32) -> (i32, i32) {
    %c0_i32 = arith.constant 0 : i32
    %c0_i32_0 = arith.constant 0 : i32
    %c0_i32_1 = arith.constant 0 : i32
    return %c0_i32, %c0_i32_0 : i32, i32
  }
  func.func @transform_3(%arg0: i32) -> (i32, i32, i32) {
    %c0_i32 = arith.constant 0 : i32
    %c0_i32_0 = arith.constant 0 : i32
    %c0_i32_1 = arith.constant 0 : i32
    %c0_i32_2 = arith.constant 0 : i32
    return %c0_i32, %c0_i32_0, %c0_i32_1 : i32, i32, i32
  }
  func.func @transform_4(%arg0: i32) -> (i32, i32, i32) {
    %c0_i32 = arith.constant 0 : i32
    %c0_i32_0 = arith.constant 0 : i32
    %c0_i32_1 = arith.constant 0 : i32
    %c0_i32_2 = arith.constant 0 : i32
    return %c0_i32, %c0_i32_0, %c0_i32_1 : i32, i32, i32
  }
  func.func @transform_5(%arg0: i32) -> (i32, i32) {
    %c0_i32 = arith.constant 0 : i32
    %c0_i32_0 = arith.constant 0 : i32
    %c0_i32_1 = arith.constant 0 : i32
    return %c0_i32, %c0_i32_0 : i32, i32
  }
  func.func @transform_6(%arg0: i32) -> (i32, i32) {
    %c0_i32 = arith.constant 0 : i32
    %c0_i32_0 = arith.constant 0 : i32
    %c0_i32_1 = arith.constant 0 : i32
    return %c0_i32, %c0_i32_0 : i32, i32
  }
  func.func @transform_7(%arg0: i32) -> (i32, i32) {
    %c0_i32 = arith.constant 0 : i32
    %c0_i32_0 = arith.constant 0 : i32
    return %arg0, %c0_i32 : i32, i32
  }
}

</mosaic_0001>

<bundles_post_ra>
// kernel: tpu_custom_call.1
= control target key start
LH: loop header
LB: loop body
LE: loop exit
PB: predicated region body
PF: predicated region fallthrough
CT: control target
= control target key end

     0   :  { %12 = vsyncpa [#allocation3], 0  ;;  %s3806_s0 = inlined_call_operand.vmem [shape: bf16[1024,16], index: 0, kind: input, shape index: {}]   ;;  %s3807_s1 = inlined_call_operand.vmem [shape: bf16[16,128], index: 1, kind: input, shape index: {}]   ;;  %s3808_s2 = inlined_call_operand.vmem [shape: f32[1,128], index: 2, kind: input, shape index: {}]   ;;  %s3809_s3 = inlined_call_operand.vmem [shape: bf16[2,128,128], index: 3, kind: input, shape index: {}]   ;;  %s3810_s4 = inlined_call_operand.vmem [shape: f32[2,1,128], index: 4, kind: input, shape index: {}]   ;;  %s3811_s5 = inlined_call_operand.vmem [shape: bf16[128,128], index: 5, kind: input, shape index: {}]   ;;  %s3812_s6 = inlined_call_operand.vmem [shape: f32[1,128], index: 6, kind: input, shape index: {}]   ;;  %s3813_s7 = inlined_call_operand.hbm [shape: f32[1024,128], index: 7, kind: output, shape index: {}]  }
   0x1   :  { %14 = vsyncpa [#allocation3 + $0x1], 0  ;;  %s3217_s24 = smov 0   ;;  %s3219_s25 = smov 0  }
   0x2   :  { %s3221_s26 = smov 0   ;;  %s3223_s27 = smov 0  }
   0x3 LB: > { %s3238_s28 = sadd.s32 4294967295, %s3172_s27   ;;  %s2416_s29 = sadd.s32 4294967294, %s3172_s27   ;;  %s3172_s27 = sphi %s3223_s27, %s3819_s27   ;;  %s3168_s26 = sphi %s3221_s26, %s3818_s26   ;;  %s3164_s25 = sphi %s3219_s25, %s3817_s25   ;;  %s3160_s24 = sphi %s3217_s24, %s3816_s24  }
   0x4   : > { %s3242_s30 = sadd.s32 1, %s3172_s27   ;;  %s179_s8 = sadd.s32 1, %s3168_s26 }
   0x5   : > { %s176_s9 = ssub.s32 %s3172_s27, %s3242_s30  ;;  %p189_p0 = scmp.ne.s32.totalorder %s3168_s26, %s3164_s25 }
   0x6   : > { %p177_p1 = scmp.eq.s32.totalorder %s176_s9, 0  ;;  %p190_p2 = scmp.eq.s32.totalorder %s3238_s28, 1 }
   0x7   : > { %p195_p3 = scmp.ne.s32.totalorder %s3164_s25, %s3160_s24  ;;  %p196_p4 = scmp.eq.s32.totalorder %s2416_s29, 1 }
   0x8   : > { %s3253_s10 = scalar_select %p177_p1, %s3168_s26, %s179_s8  }
   0x9   : > { %p3255_p5 = por %p190_p2, %p189_p0  ;;  %p3259_p6 = por %p196_p4, %p195_p3 }
   0xa   : > { %p2419_p7 = scmp.ge.s32.totalorder %s3172_s27, 1  ;;  %p241_p8 = scmp.lt.s32.totalorder %s3172_s27, 3 }
   0xc   : > { %p242_p9 = pnand %p2419_p7, %p241_p8 }
   0xd   : > { %s2421_s15 = sshll.u32 (!%p242_p9), %s3238_s28, 6  ;;  %s270_s18 = sand.u32 (!%p242_p9), 1, %s3164_s25  }
   0xe   : > { %245 = sbr.rel (%p242_p9) target bundleno = 977 (0x3d1), region = 48  ;;  %p274_p10 = scmp.lt.s32.totalorder (!%p242_p9), %s2421_s15, 127 }
   0xf   : > { %s2420_s19 = sshll.u32 (!%p242_p9), %s270_s18, 9  ;;  %s2538_s29 = sshll.u32 (!%p242_p9), %s3238_s28, 13 }
  0x10   : > { %s3626_s22 = scalar_lea.vmem (!%p242_p9), [#allocation2], %s2420_s19  ;;  %s3757_s14 = scalar_lea.hbm (!%p242_p9), %s3813_s7, %s2538_s29 }
  0x11   : > { %s2354_s8 = sshll.u32 (!%p242_p9), %s3626_s22, 4  ;;  %s3766_s28 = scalar_lea.sflag (!%p242_p9), [#allocation3], %s270_s18  ;;  %s3759_s8 = int_to_ptr.vmem [resolvable:$true] %s2354_s8 }
  0x13   : > { %v3055_v0 = vld [vmem:[%s3807_s1] sm:$0xff]   ;;  %v3088_v1 = vld [vmem:[%s3809_s3 + $0x38] sm:$0xff]   ;;  %s3821_s15 = smov (!%p274_p10, %s2421_s15), 127  ;;  %v3089_v2 = vld [vmem:[%s3809_s3 + $0x30] sm:$0xff]   ;;  %vm520_vm0 = vcmask 130048  }
  0x14   : > { %2692 = vmatprep.subr.bf16.mxu0 %v3055_v0  ;;  %2758 = vmatprep.subr.bf16.mxu1 %v3088_v1  ;;  %s2422_s20 = sshll.u32 %s3821_s15, 2  ;;  %v3090_v3 = vld [vmem:[%s3809_s3 + $0x28] sm:$0xff]   ;;  %v3091_v7 = vld [vmem:[%s3809_s3 + $0x20] sm:$0xff]   ;;  %v3092_v8 = vld [vmem:[%s3809_s3 + $0x18] sm:$0xff]   ;;  %s3174_s15 = smov [#allocation2]  }
  0x15   : > { %2693 = vmatpush3.bf16.msra.mxu0 %v3055_v0  ;;  %2759 = vmatpush3.bf16.msra.mxu1 %v3088_v1  ;;  %s3278_s23 = scalar_lea.vmem %s3806_s0, %s2422_s20  ;;  %v3093_v25 = vld [vmem:[%s3809_s3 + $0x10] sm:$0xff]   ;;  %v3094_v27 = vld [vmem:[%s3809_s3 + $0x8] sm:$0xff]   ;;  %v3095_v29 = vld [vmem:[%s3809_s3] sm:$0xff]   ;;  %s3116_s16 = sshll.u32 %s3174_s15, 4  ;;  %s3117_s16 = int_to_ptr.vmem [resolvable:$false] %s3116_s16 }
  0x16   : > { %2760 = vmatprep.subr.bf16.mxu1 %v3089_v2  ;;  %v3056_v4 = vld [vmem:[%s3278_s23] sm:$0xff]   ;;  %v3057_v5 = vld [vmem:[%s3278_s23 + $0x8] sm:$0xff]   ;;  %v3058_v6 = vld [vmem:[%s3278_s23 + $0x10] sm:$0xff]   ;;  %s3118_s17 = scalar_lea.vmem %s3117_s16, 16384  ;;  %p3119_p0 = scmp.lt.s32.totalorder %s3759_s8, %s3117_s16 }
  0x17   : > { %2694 = vmatprep.mubr.msk.bf16.mxu0 %vm520_vm0, %v3056_v4  ;;  %v3059_v9 = vld [vmem:[%s3278_s23 + $0x18] sm:$0xff]   ;;  %v3060_v10 = vld [vmem:[%s3278_s23 + $0x20] sm:$0xff]   ;;  %v3061_v11 = vld [vmem:[%s3278_s23 + $0x28] sm:$0xff]  }
  0x18   : > { %2695 = vmatmul.mubr.msk.bf16.vlgmr.msra.gmra.mxu0 %vm520_vm0, %v3057_v5  ;;  %v3062_v12 = vld [vmem:[%s3278_s23 + $0x30] sm:$0xff]   ;;  %v3063_v13 = vld [vmem:[%s3278_s23 + $0x38] sm:$0xff]   ;;  %v3064_v14 = vld [vmem:[%s3278_s23 + $0x40] sm:$0xff]  }
  0x19   : > { %2761 = vmatpush3.bf16.msra.mxu1 %v3089_v2  ;;  %2698 = vmatprep.mubr.msk.bf16.mxu0 %vm520_vm0, %v3058_v6  ;;  %v3065_v15 = vld [vmem:[%s3278_s23 + $0x48] sm:$0xff]   ;;  %v3066_v16 = vld [vmem:[%s3278_s23 + $0x50] sm:$0xff]   ;;  %v3067_v17 = vld [vmem:[%s3278_s23 + $0x58] sm:$0xff]  }
  0x1a   : > { %2762 = vmatprep.subr.bf16.mxu1 %v3090_v3  ;;  %v3068_v18 = vld [vmem:[%s3278_s23 + $0x60] sm:$0xff]   ;;  %v3069_v19 = vld [vmem:[%s3278_s23 + $0x68] sm:$0xff]   ;;  %v3070_v20 = vld [vmem:[%s3278_s23 + $0x70] sm:$0xff]  }
  0x1b   : > { %v3071_v21 = vld [vmem:[%s3278_s23 + $0x78] sm:$0xff]   ;;  %v3072_v22 = vld [vmem:[%s3278_s23 + $0x80] sm:$0xff]   ;;  %v3073_v23 = vld [vmem:[%s3278_s23 + $0x88] sm:$0xff]  }
  0x1c   : > { %v3074_v24 = vld [vmem:[%s3278_s23 + $0x90] sm:$0xff]   ;;  %v3075_v26 = vld [vmem:[%s3278_s23 + $0x98] sm:$0xff]   ;;  %v3076_v28 = vld [vmem:[%s3278_s23 + $0xa0] sm:$0xff]  }
  0x1d   : > { %2763 = vmatpush3.bf16.msra.mxu1 %v3090_v3  ;;  %v3077_v30 = vld [vmem:[%s3278_s23 + $0xa8] sm:$0xff]   ;;  %v3078_v31 = vld [vmem:[%s3278_s23 + $0xb0] sm:$0xff]   ;;  %v3079_v32 = vld [vmem:[%s3278_s23 + $0xb8] sm:$0xff]  }
  0x1e   : > { %2764 = vmatprep.subr.bf16.mxu1 %v3091_v7  ;;  %v3080_v33 = vld [vmem:[%s3278_s23 + $0xc0] sm:$0xff]   ;;  %v3081_v34 = vld [vmem:[%s3278_s23 + $0xc8] sm:$0xff]   ;;  %v3082_v35 = vld [vmem:[%s3278_s23 + $0xd0] sm:$0xff]  }
  0x1f   : > { %v3083_v36 = vld [vmem:[%s3278_s23 + $0xd8] sm:$0xff]   ;;  %v3084_v37 = vld [vmem:[%s3278_s23 + $0xe0] sm:$0xff]   ;;  %v3085_v38 = vld [vmem:[%s3278_s23 + $0xe8] sm:$0xff]  }
  0x20   : > { %2699 = vmatmul.mubr.msk.bf16.gmra.mxu0 %vm520_vm0, %v3059_v9  ;;  %v3086_v39 = vld [vmem:[%s3278_s23 + $0xf0] sm:$0xff]   ;;  %v3087_v40 = vld [vmem:[%s3278_s23 + $0xf8] sm:$0xff]   ;;  %v3098_v43 = vld [vmem:[%s3809_s3 + $0x68] sm:$0xff]   ;;  %s3112_s23 = scalar_lea.vmem %s3759_s8, 8192 }
  0x21   : > { %2765 = vmatpush3.bf16.msra.mxu1 %v3091_v7  ;;  %2702 = vmatprep.mubr.msk.bf16.mxu0 %vm520_vm0, %v3060_v10  ;;  %v3096_v41 = vld [vmem:[%s3809_s3 + $0x78] sm:$0xff]   ;;  %v3097_v42 = vld [vmem:[%s3809_s3 + $0x70] sm:$0xff]   ;;  %v3374_v46 = vld [vmem:[%s3808_s2] ss:$0 sm:$0xff]  ;;  %p3113_p11 = scmp.ne.s32.totalorder %s3759_s8, %s3112_s23  ;;  %p3120_p1 = scmp.lt.s32.totalorder %s3118_s17, %s3112_s23 }
  0x22   : > { %2766 = vmatprep.subr.bf16.mxu1 %v3092_v8  ;;  %2838 = vmatprep.subr.bf16.mxu0 %v3096_v41  ;;  %v3099_v52 = vld [vmem:[%s3809_s3 + $0x60] sm:$0xff]   ;;  %v3100_v53 = vld [vmem:[%s3809_s3 + $0x58] sm:$0xff]   ;;  %v3101_v61 = vld [vmem:[%s3809_s3 + $0x50] sm:$0xff]  }
  0x23   : > { %2839 = vmatpush3.bf16.msra.mxu0 %v3096_v41  ;;  %v3102_v5 = vld [vmem:[%s3809_s3 + $0x48] sm:$0xff]   ;;  %p3114_p12 = pnand %p3113_p11, %p3255_p5  ;;  %p3121_p2 = por %p3120_p1, %p3119_p0 }
  0x24   : > { %2840 = vmatprep.subr.bf16.mxu0 %v3097_v42 }
  0x25   : > { %2767 = vmatpush3.bf16.msra.mxu1 %v3092_v8  ;;  %p3115_p13 = pneg %p3114_p12 }
  0x26   : > { %2768 = vmatprep.subr.bf16.mxu1 %v3093_v25 }
  0x27   : > { %2841 = vmatpush3.bf16.msra.mxu0 %v3097_v42  ;;  %p3122_p3 = pnand %p3121_p2, %p3115_p13 }
  0x28   : > { %2703 = vmatmul.mubr.msk.bf16.gmra.mxu0 %vm520_vm0, %v3061_v11  ;;  %2842 = vmatprep.subr.bf16.mxu0 %v3098_v43 }
  0x29   : > { %2706 = vmatprep.mubr.msk.bf16.mxu0 %vm520_vm0, %v3062_v12  ;;  %2769 = vmatpush3.bf16.msra.mxu1 %v3093_v25 }
  0x2a   : > { %2770 = vmatprep.subr.bf16.mxu1 %v3094_v27 }
  0x2b   : > { %2843 = vmatpush3.bf16.msra.mxu0 %v3098_v43 }
  0x2c   : > { %2844 = vmatprep.subr.bf16.mxu0 %v3099_v52 }
  0x2d   : > { %2771 = vmatpush3.bf16.msra.mxu1 %v3094_v27 }
  0x2e   : > { %2772 = vmatprep.subr.bf16.mxu1 %v3095_v29 }
  0x2f   : > { %2845 = vmatpush3.bf16.msra.mxu0 %v3099_v52 }
  0x30   : > { %2707 = vmatmul.mubr.msk.bf16.gmra.mxu0 %vm520_vm0, %v3063_v13  ;;  %2846 = vmatprep.subr.bf16.mxu0 %v3100_v53  ;;  %v3103_v13 = vld [vmem:[%s3809_s3 + $0x40] sm:$0xff]  }
  0x31   : > { %2710 = vmatprep.mubr.msk.bf16.mxu0 %vm520_vm0, %v3064_v14  ;;  %2773 = vmatpush3.bf16.msra.mxu1 %v3095_v29 }
  0x33   : > { %2847 = vmatpush3.bf16.msra.mxu0 %v3100_v53 }
  0x34   : > { %2848 = vmatprep.subr.bf16.mxu0 %v3101_v61 }
  0x37   : > { %2849 = vmatpush3.bf16.msra.mxu0 %v3101_v61 }
  0x38   : > { %2711 = vmatmul.mubr.msk.bf16.gmra.mxu0 %vm520_vm0, %v3065_v15  ;;  %2850 = vmatprep.subr.bf16.mxu0 %v3102_v5 }
  0x39   : > { %2714 = vmatprep.mubr.msk.bf16.mxu0 %vm520_vm0, %v3066_v16 }
  0x3b   : > { %2851 = vmatpush3.bf16.msra.mxu0 %v3102_v5 }
  0x3c   : > { %2852 = vmatprep.subr.bf16.mxu0 %v3103_v13 }
  0x3f   : > { %2853 = vmatpush3.bf16.msra.mxu0 %v3103_v13 }
  0x40   : > { %2715 = vmatmul.mubr.msk.bf16.gmra.mxu0 %vm520_vm0, %v3067_v17 }
  0x41   : > { %2718 = vmatprep.mubr.msk.bf16.mxu0 %vm520_vm0, %v3068_v18 }
  0x48   : > { %2719 = vmatmul.mubr.msk.bf16.gmra.mxu0 %vm520_vm0, %v3069_v19 }
  0x49   : > { %2722 = vmatprep.mubr.msk.bf16.mxu0 %vm520_vm0, %v3070_v20 }
  0x50   : > { %2723 = vmatmul.mubr.msk.bf16.gmra.mxu0 %vm520_vm0, %v3071_v21 }
  0x51   : > { %2726 = vmatprep.mubr.msk.bf16.mxu0 %vm520_vm0, %v3072_v22 }
  0x58   : > { %2727 = vmatmul.mubr.msk.bf16.gmra.mxu0 %vm520_vm0, %v3073_v23 }
  0x59   : > { %2730 = vmatprep.mubr.msk.bf16.mxu0 %vm520_vm0, %v3074_v24 }
  0x60   : > { %2731 = vmatmul.mubr.msk.bf16.gmra.mxu0 %vm520_vm0, %v3075_v26 }
  0x61   : > { %2734 = vmatprep.mubr.msk.bf16.mxu0 %vm520_vm0, %v3076_v28 }
  0x68   : > { %2735 = vmatmul.mubr.msk.bf16.gmra.mxu0 %vm520_vm0, %v3077_v30 }
  0x69   : > { %2738 = vmatprep.mubr.msk.bf16.mxu0 %vm520_vm0, %v3078_v31 }
  0x70   : > { %2739 = vmatmul.mubr.msk.bf16.gmra.mxu0 %vm520_vm0, %v3079_v32 }
  0x71   : > { %2742 = vmatprep.mubr.msk.bf16.mxu0 %vm520_vm0, %v3080_v33 }
  0x78   : > { %2743 = vmatmul.mubr.msk.bf16.gmra.mxu0 %vm520_vm0, %v3081_v34 }
  0x79   : > { %2746 = vmatprep.mubr.msk.bf16.mxu0 %vm520_vm0, %v3082_v35 }
  0x80   : > { %2747 = vmatmul.mubr.msk.bf16.gmra.mxu0 %vm520_vm0, %v3083_v36 }
  0x81   : > { %2750 = vmatprep.mubr.msk.bf16.mxu0 %vm520_vm0, %v3084_v37 }
  0x88   : > { %2751 = vmatmul.mubr.msk.bf16.gmra.mxu0 %vm520_vm0, %v3085_v38 }
  0x89   : > { %2754 = vmatprep.mubr.msk.bf16.mxu0 %vm520_vm0, %v3086_v39 }
  0x90   : > { %2755 = vmatmul.mubr.msk.bf16.gmra.mxu0 %vm520_vm0, %v3087_v40 }
  0xd8   : > { %v2696_v44 = vpop.f32.mrf.mxu0 }
  0xd9   : > { %v660_v50 = vadd.f32 %v2696_v44, %v3374_v46 }
  0xda   : > { %v651_v45 = vpop.f32.mrf.mxu0 }
  0xdb   : > { %v652_v48 = vadd.f32 %v3374_v46, %v651_v45  ;;  %v908_v59 = vmax.f32 %v660_v50, 0.0 }
  0xdc   : > { %v2697_v47 = vpop.f32.mrf.mxu0 }
  0xdd   : > { %v663_v49 = vadd.f32 %v2697_v47, %v3374_v46  ;;  %v906_v57 = vmax.f32 %v652_v48, 0.0 }
  0xde   : > { %v654_v51 = vpop.f32.mrf.mxu0 }
  0xdf   : > { %v655_v54 = vadd.f32 %v3374_v46, %v654_v51  ;;  %v909_v55 = vmax.f32 %v663_v49, 0.0 }
  0xe0   : > { %v2700_v56 = vpop.f32.mrf.mxu0 }
  0xe1   : > { %v907_v58 = vmax.f32 %v655_v54, 0.0  ;;  %v971_v63 = vpack.c.bf16 %v909_v55, %v908_v59  ;;  %v676_v3 = vadd.f32 %v2700_v56, %v3374_v46 }
  0xe2   : > { %v667_v60 = vpop.f32.mrf.mxu0 }
  0xe3   : > { %v970_v62 = vpack.c.bf16 %v907_v58, %v906_v57  ;;  %v668_v1 = vadd.f32 %v3374_v46, %v667_v60  ;;  %v912_v11 = vmax.f32 %v676_v3, 0.0 }
  0xe4   : > { %v2701_v0 = vpop.f32.mrf.mxu0 }
  0xe5   : > { %v679_v2 = vadd.f32 %v2701_v0, %v3374_v46  ;;  %2774 = vmatprep.mubr.bf16.mxu1 %v970_v62  ;;  %v910_v9 = vmax.f32 %v668_v1, 0.0 }
  0xe6   : > { %v670_v4 = vpop.f32.mrf.mxu0  ;;  %2775 = vmatmul.mubr.bf16.vlgmr.msra.gmra.mxu1 %v971_v63 }
  0xe7   : > { %v671_v6 = vadd.f32 %v3374_v46, %v670_v4  ;;  %v913_v7 = vmax.f32 %v679_v2, 0.0 }
  0xe8   : > { %v2704_v8 = vpop.f32.mrf.mxu0 }
  0xe9   : > { %v911_v10 = vmax.f32 %v671_v6, 0.0  ;;  %v973_v15 = vpack.c.bf16 %v913_v7, %v912_v11  ;;  %v692_v19 = vadd.f32 %v2704_v8, %v3374_v46 }
  0xea   : > { %v683_v12 = vpop.f32.mrf.mxu0 }
  0xeb   : > { %v972_v14 = vpack.c.bf16 %v911_v10, %v910_v9  ;;  %v684_v17 = vadd.f32 %v3374_v46, %v683_v12  ;;  %v916_v26 = vmax.f32 %v692_v19, 0.0 }
  0xec   : > { %v2705_v16 = vpop.f32.mrf.mxu0 }
  0xed   : > { %v695_v18 = vadd.f32 %v2705_v16, %v3374_v46  ;;  %2778 = vmatprep.mubr.bf16.mxu1 %v972_v14  ;;  %v914_v24 = vmax.f32 %v684_v17, 0.0 }
  0xee   : > { %v686_v20 = vpop.f32.mrf.mxu0  ;;  %2779 = vmatmul.mubr.bf16.gmra.mxu1 %v973_v15 }
  0xef   : > { %v687_v21 = vadd.f32 %v3374_v46, %v686_v20  ;;  %v917_v22 = vmax.f32 %v695_v18, 0.0 }
  0xf0   : > { %v2708_v23 = vpop.f32.mrf.mxu0 }
  0xf1   : > { %v915_v25 = vmax.f32 %v687_v21, 0.0  ;;  %v975_v29 = vpack.c.bf16 %v917_v22, %v916_v26  ;;  %v708_v33 = vadd.f32 %v2708_v23, %v3374_v46 }
  0xf2   : > { %v699_v27 = vpop.f32.mrf.mxu0 }
  0xf3   : > { %v974_v28 = vpack.c.bf16 %v915_v25, %v914_v24  ;;  %v700_v31 = vadd.f32 %v3374_v46, %v699_v27  ;;  %v920_v40 = vmax.f32 %v708_v33, 0.0 }
  0xf4   : > { %v2709_v30 = vpop.f32.mrf.mxu0 }
  0xf5   : > { %v711_v32 = vadd.f32 %v2709_v30, %v3374_v46  ;;  %2782 = vmatprep.mubr.bf16.mxu1 %v974_v28  ;;  %v918_v38 = vmax.f32 %v700_v31, 0.0 }
  0xf6   : > { %v702_v34 = vpop.f32.mrf.mxu0  ;;  %2783 = vmatmul.mubr.bf16.gmra.mxu1 %v975_v29 }
  0xf7   : > { %v703_v35 = vadd.f32 %v3374_v46, %v702_v34  ;;  %v921_v36 = vmax.f32 %v711_v32, 0.0 }
  0xf8   : > { %v2712_v37 = vpop.f32.mrf.mxu0 }
  0xf9   : > { %v919_v39 = vmax.f32 %v703_v35, 0.0  ;;  %v977_v43 = vpack.c.bf16 %v921_v36, %v920_v40  ;;  %v724_v48 = vadd.f32 %v2712_v37, %v3374_v46 }
  0xfa   : > { %v715_v41 = vpop.f32.mrf.mxu0 }
  0xfb   : > { %v976_v42 = vpack.c.bf16 %v919_v39, %v918_v38  ;;  %v716_v45 = vadd.f32 %v3374_v46, %v715_v41  ;;  %v924_v55 = vmax.f32 %v724_v48, 0.0 }
  0xfc   : > { %v2713_v44 = vpop.f32.mrf.mxu0 }
  0xfd   : > { %v727_v47 = vadd.f32 %v2713_v44, %v3374_v46  ;;  %2786 = vmatprep.mubr.bf16.mxu1 %v976_v42  ;;  %v922_v53 = vmax.f32 %v716_v45, 0.0 }
  0xfe   : > { %v718_v49 = vpop.f32.mrf.mxu0  ;;  %2787 = vmatmul.mubr.bf16.gmra.mxu1 %v977_v43 }
  0xff   : > { %v719_v50 = vadd.f32 %v3374_v46, %v718_v49  ;;  %v925_v51 = vmax.f32 %v727_v47, 0.0 }
 0x100   : > { %v2716_v52 = vpop.f32.mrf.mxu0 }
 0x101   : > { %v923_v54 = vmax.f32 %v719_v50, 0.0  ;;  %v979_v58 = vpack.c.bf16 %v925_v51, %v924_v55  ;;  %v740_v62 = vadd.f32 %v2716_v52, %v3374_v46 }
 0x102   : > { %v731_v56 = vpop.f32.mrf.mxu0 }
 0x103   : > { %v978_v57 = vpack.c.bf16 %v923_v54, %v922_v53  ;;  %v732_v60 = vadd.f32 %v3374_v46, %v731_v56  ;;  %v928_v5 = vmax.f32 %v740_v62, 0.0 }
 0x104   : > { %v2717_v59 = vpop.f32.mrf.mxu0 }
 0x105   : > { %v743_v61 = vadd.f32 %v2717_v59, %v3374_v46  ;;  %2790 = vmatprep.mubr.bf16.mxu1 %v978_v57  ;;  %v926_v3 = vmax.f32 %v732_v60, 0.0 }
 0x106   : > { %v734_v63 = vpop.f32.mrf.mxu0  ;;  %2791 = vmatmul.mubr.bf16.gmra.mxu1 %v979_v58 }
 0x107   : > { %v735_v0 = vadd.f32 %v3374_v46, %v734_v63  ;;  %v929_v1 = vmax.f32 %v743_v61, 0.0 }
 0x108   : > { %v2720_v2 = vpop.f32.mrf.mxu0 }
 0x109   : > { %v927_v4 = vmax.f32 %v735_v0, 0.0  ;;  %v981_v8 = vpack.c.bf16 %v929_v1, %v928_v5  ;;  %v756_v12 = vadd.f32 %v2720_v2, %v3374_v46 }
 0x10a   : > { %v747_v6 = vpop.f32.mrf.mxu0 }
 0x10b   : > { %v980_v7 = vpack.c.bf16 %v927_v4, %v926_v3  ;;  %v748_v10 = vadd.f32 %v3374_v46, %v747_v6  ;;  %v932_v19 = vmax.f32 %v756_v12, 0.0 }
 0x10c   : > { %v2721_v9 = vpop.f32.mrf.mxu0 }
 0x10d   : > { %v759_v11 = vadd.f32 %v2721_v9, %v3374_v46  ;;  %2794 = vmatprep.mubr.bf16.mxu1 %v980_v7  ;;  %v930_v17 = vmax.f32 %v748_v10, 0.0 }
 0x10e   : > { %v750_v13 = vpop.f32.mrf.mxu0  ;;  %2795 = vmatmul.mubr.bf16.gmra.mxu1 %v981_v8 }
 0x10f   : > { %v751_v14 = vadd.f32 %v3374_v46, %v750_v13  ;;  %v933_v15 = vmax.f32 %v759_v11, 0.0 }
 0x110   : > { %v2724_v16 = vpop.f32.mrf.mxu0 }
 0x111   : > { %v931_v18 = vmax.f32 %v751_v14, 0.0  ;;  %v983_v22 = vpack.c.bf16 %v933_v15, %v932_v19  ;;  %v772_v26 = vadd.f32 %v2724_v16, %v3374_v46 }
 0x112   : > { %v763_v20 = vpop.f32.mrf.mxu0 }
 0x113   : > { %v982_v21 = vpack.c.bf16 %v931_v18, %v930_v17  ;;  %v764_v24 = vadd.f32 %v3374_v46, %v763_v20  ;;  %v936_v33 = vmax.f32 %v772_v26, 0.0 }
 0x114   : > { %v2725_v23 = vpop.f32.mrf.mxu0 }
 0x115   : > { %v775_v25 = vadd.f32 %v2725_v23, %v3374_v46  ;;  %2798 = vmatprep.mubr.bf16.mxu1 %v982_v21  ;;  %v934_v31 = vmax.f32 %v764_v24, 0.0 }
 0x116   : > { %v766_v27 = vpop.f32.mrf.mxu0  ;;  %2799 = vmatmul.mubr.bf16.gmra.mxu1 %v983_v22 }
 0x117   : > { %v767_v28 = vadd.f32 %v3374_v46, %v766_v27  ;;  %v937_v29 = vmax.f32 %v775_v25, 0.0 }
 0x118   : > { %v2728_v30 = vpop.f32.mrf.mxu0 }
 0x119   : > { %v935_v32 = vmax.f32 %v767_v28, 0.0  ;;  %v985_v36 = vpack.c.bf16 %v937_v29, %v936_v33  ;;  %v788_v40 = vadd.f32 %v2728_v30, %v3374_v46 }
 0x11a   : > { %v779_v34 = vpop.f32.mrf.mxu0 }
 0x11b   : > { %v984_v35 = vpack.c.bf16 %v935_v32, %v934_v31  ;;  %v780_v38 = vadd.f32 %v3374_v46, %v779_v34  ;;  %v940_v48 = vmax.f32 %v788_v40, 0.0 }
 0x11c   : > { %v2729_v37 = vpop.f32.mrf.mxu0 }
 0x11d   : > { %v791_v39 = vadd.f32 %v2729_v37, %v3374_v46  ;;  %2802 = vmatprep.mubr.bf16.mxu1 %v984_v35  ;;  %v938_v45 = vmax.f32 %v780_v38, 0.0 }
 0x11e   : > { %v782_v41 = vpop.f32.mrf.mxu0  ;;  %2803 = vmatmul.mubr.bf16.gmra.mxu1 %v985_v36 }
 0x11f   : > { %v783_v42 = vadd.f32 %v3374_v46, %v782_v41  ;;  %v941_v43 = vmax.f32 %v791_v39, 0.0 }
 0x120   : > { %v2732_v44 = vpop.f32.mrf.mxu0 }
 0x121   : > { %v939_v47 = vmax.f32 %v783_v42, 0.0  ;;  %v987_v51 = vpack.c.bf16 %v941_v43, %v940_v48  ;;  %v804_v55 = vadd.f32 %v2732_v44, %v3374_v46 }
 0x122   : > { %v795_v49 = vpop.f32.mrf.mxu0 }
 0x123   : > { %v986_v50 = vpack.c.bf16 %v939_v47, %v938_v45  ;;  %v796_v53 = vadd.f32 %v3374_v46, %v795_v49  ;;  %v944_v62 = vmax.f32 %v804_v55, 0.0 }
 0x124   : > { %v2733_v52 = vpop.f32.mrf.mxu0 }
 0x125   : > { %v807_v54 = vadd.f32 %v2733_v52, %v3374_v46  ;;  %2806 = vmatprep.mubr.bf16.mxu1 %v986_v50  ;;  %v942_v60 = vmax.f32 %v796_v53, 0.0 }
 0x126   : > { %v798_v56 = vpop.f32.mrf.mxu0  ;;  %2807 = vmatmul.mubr.bf16.gmra.mxu1 %v987_v51 }
 0x127   : > { %v799_v57 = vadd.f32 %v3374_v46, %v798_v56  ;;  %v945_v58 = vmax.f32 %v807_v54, 0.0 }
 0x128   : > { %v2736_v59 = vpop.f32.mrf.mxu0 }
 0x129   : > { %v943_v61 = vmax.f32 %v799_v57, 0.0  ;;  %v989_v1 = vpack.c.bf16 %v945_v58, %v944_v62  ;;  %v820_v5 = vadd.f32 %v2736_v59, %v3374_v46 }
 0x12a   : > { %v811_v63 = vpop.f32.mrf.mxu0 }
 0x12b   : > { %v988_v0 = vpack.c.bf16 %v943_v61, %v942_v60  ;;  %v812_v3 = vadd.f32 %v3374_v46, %v811_v63  ;;  %v948_v12 = vmax.f32 %v820_v5, 0.0 }
 0x12c   : > { %v2737_v2 = vpop.f32.mrf.mxu0 }
 0x12d   : > { %v823_v4 = vadd.f32 %v2737_v2, %v3374_v46  ;;  %2810 = vmatprep.mubr.bf16.mxu1 %v988_v0  ;;  %v946_v10 = vmax.f32 %v812_v3, 0.0 }
 0x12e   : > { %v814_v6 = vpop.f32.mrf.mxu0  ;;  %2811 = vmatmul.mubr.bf16.gmra.mxu1 %v989_v1 }
 0x12f   : > { %v815_v7 = vadd.f32 %v3374_v46, %v814_v6  ;;  %v949_v8 = vmax.f32 %v823_v4, 0.0 }
 0x130   : > { %v2740_v9 = vpop.f32.mrf.mxu0 }
 0x131   : > { %v947_v11 = vmax.f32 %v815_v7, 0.0  ;;  %v991_v15 = vpack.c.bf16 %v949_v8, %v948_v12  ;;  %v836_v19 = vadd.f32 %v2740_v9, %v3374_v46 }
 0x132   : > { %v827_v13 = vpop.f32.mrf.mxu0 }
 0x133   : > { %v990_v14 = vpack.c.bf16 %v947_v11, %v946_v10  ;;  %v828_v17 = vadd.f32 %v3374_v46, %v827_v13  ;;  %v952_v26 = vmax.f32 %v836_v19, 0.0 }
 0x134   : > { %v2741_v16 = vpop.f32.mrf.mxu0 }
 0x135   : > { %v839_v18 = vadd.f32 %v2741_v16, %v3374_v46  ;;  %2814 = vmatprep.mubr.bf16.mxu1 %v990_v14  ;;  %v950_v24 = vmax.f32 %v828_v17, 0.0 }
 0x136   : > { %v830_v20 = vpop.f32.mrf.mxu0  ;;  %2815 = vmatmul.mubr.bf16.gmra.mxu1 %v991_v15 }
 0x137   : > { %v831_v21 = vadd.f32 %v3374_v46, %v830_v20  ;;  %v953_v22 = vmax.f32 %v839_v18, 0.0 }
 0x138   : > { %v2744_v23 = vpop.f32.mrf.mxu0 }
 0x139   : > { %v951_v25 = vmax.f32 %v831_v21, 0.0  ;;  %v993_v29 = vpack.c.bf16 %v953_v22, %v952_v26  ;;  %v852_v33 = vadd.f32 %v2744_v23, %v3374_v46  ;;  %v3104_v21 = vld [vmem:[%s3811_s5 + $0x38] sm:$0xff]   ;;  %v3105_v22 = vld [vmem:[%s3811_s5 + $0x30] sm:$0xff]  }
 0x13a   : > { %v843_v27 = vpop.f32.mrf.mxu0  ;;  %2998 = vmatprep.subr.bf16.mxu1 %v3104_v21  ;;  %2918 = vmatprep.subr.bf16.mxu0 %v3104_v21 }
 0x13b   : > { %v992_v28 = vpack.c.bf16 %v951_v25, %v950_v24  ;;  %v844_v31 = vadd.f32 %v3374_v46, %v843_v27  ;;  %v956_v40 = vmax.f32 %v852_v33, 0.0  ;;  %3006 = vmatpush3.bf16.msra.mxu1 %v3104_v21  ;;  %v3464_v24 = vld [vmem:[%s3810_s4] ss:$0 sm:$0xff]  ;;  %v3106_v25 = vld [vmem:[%s3811_s5 + $0x28] sm:$0xff]  }
 0x13c   : > { %v2745_v30 = vpop.f32.mrf.mxu0  ;;  %2999 = vmatprep.subr.bf16.mxu1 %v3105_v22 }
 0x13d   : > { %v855_v32 = vadd.f32 %v2745_v30, %v3374_v46  ;;  %2818 = vmatprep.mubr.bf16.mxu1 %v992_v28  ;;  %v954_v38 = vmax.f32 %v844_v31, 0.0  ;;  %v3107_v31 = vld [vmem:[%s3811_s5 + $0x20] sm:$0xff]  }
 0x13e   : > { %v846_v34 = vpop.f32.mrf.mxu0  ;;  %2819 = vmatmul.mubr.bf16.gmra.mxu1 %v993_v29 }
 0x13f   : > { %v847_v35 = vadd.f32 %v3374_v46, %v846_v34  ;;  %v957_v36 = vmax.f32 %v855_v32, 0.0  ;;  %3007 = vmatpush3.bf16.msra.mxu1 %v3105_v22 }
 0x140   : > { %v2748_v37 = vpop.f32.mrf.mxu0  ;;  %3000 = vmatprep.subr.bf16.mxu1 %v3106_v25 }
 0x141   : > { %v955_v39 = vmax.f32 %v847_v35, 0.0  ;;  %v995_v43 = vpack.c.bf16 %v957_v36, %v956_v40  ;;  %v868_v48 = vadd.f32 %v2748_v37, %v3374_v46  ;;  %v3108_v37 = vld [vmem:[%s3811_s5 + $0x18] sm:$0xff]  }
 0x142   : > { %v859_v41 = vpop.f32.mrf.mxu0 }
 0x143   : > { %v994_v42 = vpack.c.bf16 %v955_v39, %v954_v38  ;;  %v860_v45 = vadd.f32 %v3374_v46, %v859_v41  ;;  %v960_v55 = vmax.f32 %v868_v48, 0.0  ;;  %3008 = vmatpush3.bf16.msra.mxu1 %v3106_v25 }
 0x144   : > { %v2749_v44 = vpop.f32.mrf.mxu0  ;;  %3001 = vmatprep.subr.bf16.mxu1 %v3107_v31 }
 0x145   : > { %v871_v47 = vadd.f32 %v2749_v44, %v3374_v46  ;;  %2822 = vmatprep.mubr.bf16.mxu1 %v994_v42  ;;  %v958_v53 = vmax.f32 %v860_v45, 0.0  ;;  %v3109_v45 = vld [vmem:[%s3811_s5 + $0x10] sm:$0xff]  }
 0x146   : > { %v862_v49 = vpop.f32.mrf.mxu0  ;;  %2823 = vmatmul.mubr.bf16.gmra.mxu1 %v995_v43 }
 0x147   : > { %v863_v50 = vadd.f32 %v3374_v46, %v862_v49  ;;  %v961_v51 = vmax.f32 %v871_v47, 0.0  ;;  %3009 = vmatpush3.bf16.msra.mxu1 %v3107_v31 }
 0x148   : > { %v2752_v52 = vpop.f32.mrf.mxu0  ;;  %3002 = vmatprep.subr.bf16.mxu1 %v3108_v37 }
 0x149   : > { %v959_v54 = vmax.f32 %v863_v50, 0.0  ;;  %v997_v58 = vpack.c.bf16 %v961_v51, %v960_v55  ;;  %v884_v62 = vadd.f32 %v2752_v52, %v3374_v46 }
 0x14a   : > { %v875_v56 = vpop.f32.mrf.mxu0 }
 0x14b   : > { %v996_v57 = vpack.c.bf16 %v959_v54, %v958_v53  ;;  %v876_v60 = vadd.f32 %v3374_v46, %v875_v56  ;;  %v964_v5 = vmax.f32 %v884_v62, 0.0  ;;  %3010 = vmatpush3.bf16.msra.mxu1 %v3108_v37  ;;  %v3110_v54 = vld [vmem:[%s3811_s5 + $0x8] sm:$0xff]  }
 0x14c   : > { %v2753_v59 = vpop.f32.mrf.mxu0  ;;  %3003 = vmatprep.subr.bf16.mxu1 %v3109_v45 }
 0x14d   : > { %v887_v61 = vadd.f32 %v2753_v59, %v3374_v46  ;;  %2826 = vmatprep.mubr.bf16.mxu1 %v996_v57  ;;  %v962_v3 = vmax.f32 %v876_v60, 0.0 }
 0x14e   : > { %v878_v63 = vpop.f32.mrf.mxu0  ;;  %2827 = vmatmul.mubr.bf16.gmra.mxu1 %v997_v58 }
 0x14f   : > { %v879_v0 = vadd.f32 %v3374_v46, %v878_v63  ;;  %v965_v1 = vmax.f32 %v887_v61, 0.0  ;;  %3011 = vmatpush3.bf16.msra.mxu1 %v3109_v45 }
 0x150   : > { %v2756_v2 = vpop.f32.mrf.mxu0  ;;  %3004 = vmatprep.subr.bf16.mxu1 %v3110_v54 }
 0x151   : > { %v963_v4 = vmax.f32 %v879_v0, 0.0  ;;  %v999_v8 = vpack.c.bf16 %v965_v1, %v964_v5  ;;  %v900_v12 = vadd.f32 %v2756_v2, %v3374_v46 }
 0x152   : > { %v891_v6 = vpop.f32.mrf.mxu0 }
 0x153   : > { %v998_v7 = vpack.c.bf16 %v963_v4, %v962_v3  ;;  %v892_v10 = vadd.f32 %v3374_v46, %v891_v6  ;;  %v968_v18 = vmax.f32 %v900_v12, 0.0  ;;  %3012 = vmatpush3.bf16.msra.mxu1 %v3110_v54 }
 0x154   : > { %v2757_v9 = vpop.f32.mrf.mxu0 }
 0x155   : > { %v903_v11 = vadd.f32 %v2757_v9, %v3374_v46  ;;  %2830 = vmatprep.mubr.bf16.mxu1 %v998_v7  ;;  %v966_v16 = vmax.f32 %v892_v10, 0.0 }
 0x156   : > { %v894_v13 = vpop.f32.mrf.mxu0  ;;  %2831 = vmatmul.mubr.bf16.gmra.mxu1 %v999_v8 }
 0x157   : > { %v895_v14 = vadd.f32 %v3374_v46, %v894_v13  ;;  %v969_v15 = vmax.f32 %v903_v11, 0.0 }
 0x159   : > { %v967_v17 = vmax.f32 %v895_v14, 0.0  ;;  %v1001_v20 = vpack.c.bf16 %v969_v15, %v968_v18 }
 0x15b   : > { %v1000_v19 = vpack.c.bf16 %v967_v17, %v966_v16 }
 0x15d   : > { %2834 = vmatprep.mubr.bf16.mxu1 %v1000_v19 }
 0x15e   : > { %2835 = vmatmul.mubr.bf16.gmra.mxu1 %v1001_v20 }
 0x1a6   : > { %v2776_v46 = vpop.f32.mrf.mxu1 }
 0x1a7   : > { %v1116_v29 = vadd.f32 %v2776_v46, %v3464_v24 }
 0x1a8   : > { %v1107_v23 = vpop.f32.mrf.mxu1 }
 0x1a9   : > { %v1108_v27 = vadd.f32 %v3464_v24, %v1107_v23  ;;  %v1364_v38 = vmax.f32 %v1116_v29, 0.0 }
 0x1aa   : > { %v2777_v26 = vpop.f32.mrf.mxu1 }
 0x1ab   : > { %v1119_v28 = vadd.f32 %v2777_v26, %v3464_v24  ;;  %v1362_v35 = vmax.f32 %v1108_v27, 0.0 }
 0x1ac   : > { %v1110_v30 = vpop.f32.mrf.mxu1 }
 0x1ad   : > { %v1111_v32 = vadd.f32 %v3464_v24, %v1110_v30  ;;  %v1365_v33 = vmax.f32 %v1119_v28, 0.0 }
 0x1ae   : > { %v2780_v34 = vpop.f32.mrf.mxu1 }
 0x1af   : > { %v1363_v36 = vmax.f32 %v1111_v32, 0.0  ;;  %v1427_v41 = vpack.c.bf16 %v1365_v33, %v1364_v38  ;;  %v1132_v47 = vadd.f32 %v2780_v34, %v3464_v24 }
 0x1b0   : > { %v1123_v39 = vpop.f32.mrf.mxu1 }
 0x1b1   : > { %v1426_v40 = vpack.c.bf16 %v1363_v36, %v1362_v35  ;;  %v1124_v43 = vadd.f32 %v3464_v24, %v1123_v39  ;;  %v1368_v55 = vmax.f32 %v1132_v47, 0.0 }
 0x1b2   : > { %v2781_v42 = vpop.f32.mrf.mxu1 }
 0x1b3   : > { %v1135_v44 = vadd.f32 %v2781_v42, %v3464_v24  ;;  %2854 = vmatprep.mubr.bf16.mxu0 %v1426_v40  ;;  %v1366_v52 = vmax.f32 %v1124_v43, 0.0 }
 0x1b4   : > { %v1126_v48 = vpop.f32.mrf.mxu1  ;;  %2855 = vmatmul.mubr.bf16.vlgmr.msra.gmra.mxu0 %v1427_v41 }
 0x1b5   : > { %v1127_v49 = vadd.f32 %v3464_v24, %v1126_v48  ;;  %2919 = vmatpush3.bf16.msra.mxu0 %v3104_v21  ;;  %v1369_v50 = vmax.f32 %v1135_v44, 0.0 }
 0x1b6   : > { %v2784_v51 = vpop.f32.mrf.mxu1  ;;  %2920 = vmatprep.subr.bf16.mxu0 %v3105_v22 }
 0x1b7   : > { %v1367_v53 = vmax.f32 %v1127_v49, 0.0  ;;  %v1429_v58 = vpack.c.bf16 %v1369_v50, %v1368_v55  ;;  %v1148_v62 = vadd.f32 %v2784_v51, %v3464_v24 }
 0x1b8   : > { %v1139_v56 = vpop.f32.mrf.mxu1 }
 0x1b9   : > { %v1428_v57 = vpack.c.bf16 %v1367_v53, %v1366_v52  ;;  %2921 = vmatpush3.bf16.msra.mxu0 %v3105_v22  ;;  %v1140_v60 = vadd.f32 %v3464_v24, %v1139_v56  ;;  %v1372_v5 = vmax.f32 %v1148_v62, 0.0 }
 0x1ba   : > { %v2785_v59 = vpop.f32.mrf.mxu1  ;;  %2922 = vmatprep.subr.bf16.mxu0 %v3106_v25 }
 0x1bb   : > { %v1151_v61 = vadd.f32 %v2785_v59, %v3464_v24  ;;  %2858 = vmatprep.mubr.bf16.mxu0 %v1428_v57  ;;  %v1370_v3 = vmax.f32 %v1140_v60, 0.0 }
 0x1bc   : > { %v1142_v63 = vpop.f32.mrf.mxu1  ;;  %2859 = vmatmul.mubr.bf16.gmra.mxu0 %v1429_v58 }
 0x1bd   : > { %v1143_v0 = vadd.f32 %v3464_v24, %v1142_v63  ;;  %2923 = vmatpush3.bf16.msra.mxu0 %v3106_v25  ;;  %v1373_v1 = vmax.f32 %v1151_v61, 0.0 }
 0x1be   : > { %v2788_v2 = vpop.f32.mrf.mxu1  ;;  %2924 = vmatprep.subr.bf16.mxu0 %v3107_v31 }
 0x1bf   : > { %v1371_v4 = vmax.f32 %v1143_v0, 0.0  ;;  %v1431_v8 = vpack.c.bf16 %v1373_v1, %v1372_v5  ;;  %v1164_v12 = vadd.f32 %v2788_v2, %v3464_v24 }
 0x1c0   : > { %v1155_v6 = vpop.f32.mrf.mxu1 }
 0x1c1   : > { %v1430_v7 = vpack.c.bf16 %v1371_v4, %v1370_v3  ;;  %2925 = vmatpush3.bf16.msra.mxu0 %v3107_v31  ;;  %v1156_v10 = vadd.f32 %v3464_v24, %v1155_v6  ;;  %v1376_v19 = vmax.f32 %v1164_v12, 0.0 }
 0x1c2   : > { %v2789_v9 = vpop.f32.mrf.mxu1  ;;  %2926 = vmatprep.subr.bf16.mxu0 %v3108_v37 }
 0x1c3   : > { %v1167_v11 = vadd.f32 %v2789_v9, %v3464_v24  ;;  %2862 = vmatprep.mubr.bf16.mxu0 %v1430_v7  ;;  %v1374_v17 = vmax.f32 %v1156_v10, 0.0 }
 0x1c4   : > { %v1158_v13 = vpop.f32.mrf.mxu1  ;;  %2863 = vmatmul.mubr.bf16.gmra.mxu0 %v1431_v8 }
 0x1c5   : > { %v1159_v14 = vadd.f32 %v3464_v24, %v1158_v13  ;;  %2927 = vmatpush3.bf16.msra.mxu0 %v3108_v37  ;;  %v1377_v15 = vmax.f32 %v1167_v11, 0.0 }
 0x1c6   : > { %v2792_v16 = vpop.f32.mrf.mxu1  ;;  %2928 = vmatprep.subr.bf16.mxu0 %v3109_v45 }
 0x1c7   : > { %v1375_v18 = vmax.f32 %v1159_v14, 0.0  ;;  %v1433_v22 = vpack.c.bf16 %v1377_v15, %v1376_v19  ;;  %v1180_v26 = vadd.f32 %v2792_v16, %v3464_v24 }
 0x1c8   : > { %v1171_v20 = vpop.f32.mrf.mxu1 }
 0x1c9   : > { %v1432_v21 = vpack.c.bf16 %v1375_v18, %v1374_v17  ;;  %2929 = vmatpush3.bf16.msra.mxu0 %v3109_v45  ;;  %v1172_v23 = vadd.f32 %v3464_v24, %v1171_v20  ;;  %v1380_v33 = vmax.f32 %v1180_v26, 0.0 }
 0x1ca   : > { %v2793_v46 = vpop.f32.mrf.mxu1  ;;  %2930 = vmatprep.subr.bf16.mxu0 %v3110_v54 }
 0x1cb   : > { %v1183_v25 = vadd.f32 %v2793_v46, %v3464_v24  ;;  %2866 = vmatprep.mubr.bf16.mxu0 %v1432_v21  ;;  %v1378_v31 = vmax.f32 %v1172_v23, 0.0 }
 0x1cc   : > { %v1174_v27 = vpop.f32.mrf.mxu1  ;;  %2867 = vmatmul.mubr.bf16.gmra.mxu0 %v1433_v22 }
 0x1cd   : > { %v1175_v28 = vadd.f32 %v3464_v24, %v1174_v27  ;;  %2931 = vmatpush3.bf16.msra.mxu0 %v3110_v54  ;;  %v1381_v29 = vmax.f32 %v1183_v25, 0.0 }
 0x1ce   : > { %v2796_v30 = vpop.f32.mrf.mxu1 }
 0x1cf   : > { %v1379_v32 = vmax.f32 %v1175_v28, 0.0  ;;  %v1435_v36 = vpack.c.bf16 %v1381_v29, %v1380_v33  ;;  %v1196_v40 = vadd.f32 %v2796_v30, %v3464_v24 }
 0x1d0   : > { %v1187_v34 = vpop.f32.mrf.mxu1 }
 0x1d1   : > { %v1434_v35 = vpack.c.bf16 %v1379_v32, %v1378_v31  ;;  %v1188_v38 = vadd.f32 %v3464_v24, %v1187_v34  ;;  %v1384_v48 = vmax.f32 %v1196_v40, 0.0 }
 0x1d2   : > { %v2797_v37 = vpop.f32.mrf.mxu1 }
 0x1d3   : > { %v1199_v39 = vadd.f32 %v2797_v37, %v3464_v24  ;;  %2870 = vmatprep.mubr.bf16.mxu0 %v1434_v35  ;;  %v1382_v45 = vmax.f32 %v1188_v38, 0.0 }
 0x1d4   : > { %v1190_v41 = vpop.f32.mrf.mxu1  ;;  %2871 = vmatmul.mubr.bf16.gmra.mxu0 %v1435_v36 }
 0x1d5   : > { %v1191_v42 = vadd.f32 %v3464_v24, %v1190_v41  ;;  %v1385_v43 = vmax.f32 %v1199_v39, 0.0 }
 0x1d6   : > { %v2800_v44 = vpop.f32.mrf.mxu1 }
 0x1d7   : > { %v1383_v47 = vmax.f32 %v1191_v42, 0.0  ;;  %v1437_v51 = vpack.c.bf16 %v1385_v43, %v1384_v48  ;;  %v1212_v55 = vadd.f32 %v2800_v44, %v3464_v24 }
 0x1d8   : > { %v1203_v49 = vpop.f32.mrf.mxu1 }
 0x1d9   : > { %v1436_v50 = vpack.c.bf16 %v1383_v47, %v1382_v45  ;;  %v1204_v53 = vadd.f32 %v3464_v24, %v1203_v49  ;;  %v1388_v62 = vmax.f32 %v1212_v55, 0.0 }
 0x1da   : > { %v2801_v52 = vpop.f32.mrf.mxu1 }
 0x1db   : > { %v1215_v54 = vadd.f32 %v2801_v52, %v3464_v24  ;;  %2874 = vmatprep.mubr.bf16.mxu0 %v1436_v50  ;;  %v1386_v60 = vmax.f32 %v1204_v53, 0.0  ;;  %v3111_v50 = vld [vmem:[%s3811_s5] sm:$0xff]  }
 0x1dc   : > { %v1206_v56 = vpop.f32.mrf.mxu1  ;;  %2875 = vmatmul.mubr.bf16.gmra.mxu0 %v1437_v51  ;;  %3005 = vmatprep.subr.bf16.mxu1 %v3111_v50 }
 0x1dd   : > { %v1207_v57 = vadd.f32 %v3464_v24, %v1206_v56  ;;  %v1389_v58 = vmax.f32 %v1215_v54, 0.0  ;;  %2932 = vmatprep.subr.bf16.mxu0 %v3111_v50  ;;  %3013 = vmatpush3.bf16.msra.mxu1 %v3111_v50 }
 0x1de   : > { %v2804_v59 = vpop.f32.mrf.mxu1  ;;  %2933 = vmatpush3.bf16.msra.mxu0 %v3111_v50 }
 0x1df   : > { %v1387_v61 = vmax.f32 %v1207_v57, 0.0  ;;  %v1439_v1 = vpack.c.bf16 %v1389_v58, %v1388_v62  ;;  %v1228_v5 = vadd.f32 %v2804_v59, %v3464_v24 }
 0x1e0   : > { %v1219_v63 = vpop.f32.mrf.mxu1 }
 0x1e1   : > { %v1438_v0 = vpack.c.bf16 %v1387_v61, %v1386_v60  ;;  %v1220_v3 = vadd.f32 %v3464_v24, %v1219_v63  ;;  %v1392_v12 = vmax.f32 %v1228_v5, 0.0 }
 0x1e2   : > { %v2805_v2 = vpop.f32.mrf.mxu1 }
 0x1e3   : > { %v1231_v4 = vadd.f32 %v2805_v2, %v3464_v24  ;;  %2878 = vmatprep.mubr.bf16.mxu0 %v1438_v0  ;;  %v1390_v10 = vmax.f32 %v1220_v3, 0.0 }
 0x1e4   : > { %v1222_v6 = vpop.f32.mrf.mxu1  ;;  %2879 = vmatmul.mubr.bf16.gmra.mxu0 %v1439_v1 }
 0x1e5   : > { %v1223_v7 = vadd.f32 %v3464_v24, %v1222_v6  ;;  %v1393_v8 = vmax.f32 %v1231_v4, 0.0 }
 0x1e6   : > { %v2808_v9 = vpop.f32.mrf.mxu1 }
 0x1e7   : > { %v1391_v11 = vmax.f32 %v1223_v7, 0.0  ;;  %v1441_v15 = vpack.c.bf16 %v1393_v8, %v1392_v12  ;;  %v1244_v19 = vadd.f32 %v2808_v9, %v3464_v24 }
 0x1e8   : > { %v1235_v13 = vpop.f32.mrf.mxu1 }
 0x1e9   : > { %v1440_v14 = vpack.c.bf16 %v1391_v11, %v1390_v10  ;;  %v1236_v17 = vadd.f32 %v3464_v24, %v1235_v13  ;;  %v1396_v26 = vmax.f32 %v1244_v19, 0.0 }
 0x1ea   : > { %v2809_v16 = vpop.f32.mrf.mxu1 }
 0x1eb   : > { %v1247_v18 = vadd.f32 %v2809_v16, %v3464_v24  ;;  %2882 = vmatprep.mubr.bf16.mxu0 %v1440_v14  ;;  %v1394_v23 = vmax.f32 %v1236_v17, 0.0 }
 0x1ec   : > { %v1238_v20 = vpop.f32.mrf.mxu1  ;;  %2883 = vmatmul.mubr.bf16.gmra.mxu0 %v1441_v15 }
 0x1ed   : > { %v1239_v21 = vadd.f32 %v3464_v24, %v1238_v20  ;;  %v1397_v22 = vmax.f32 %v1247_v18, 0.0 }
 0x1ee   : > { %v2812_v46 = vpop.f32.mrf.mxu1 }
 0x1ef   : > { %v1395_v25 = vmax.f32 %v1239_v21, 0.0  ;;  %v1443_v29 = vpack.c.bf16 %v1397_v22, %v1396_v26  ;;  %v1260_v33 = vadd.f32 %v2812_v46, %v3464_v24 }
 0x1f0   : > { %v1251_v27 = vpop.f32.mrf.mxu1 }
 0x1f1   : > { %v1442_v28 = vpack.c.bf16 %v1395_v25, %v1394_v23  ;;  %v1252_v31 = vadd.f32 %v3464_v24, %v1251_v27  ;;  %v1400_v40 = vmax.f32 %v1260_v33, 0.0 }
 0x1f2   : > { %v2813_v30 = vpop.f32.mrf.mxu1 }
 0x1f3   : > { %v1263_v32 = vadd.f32 %v2813_v30, %v3464_v24  ;;  %2886 = vmatprep.mubr.bf16.mxu0 %v1442_v28  ;;  %v1398_v38 = vmax.f32 %v1252_v31, 0.0 }
 0x1f4   : > { %v1254_v34 = vpop.f32.mrf.mxu1  ;;  %2887 = vmatmul.mubr.bf16.gmra.mxu0 %v1443_v29 }
 0x1f5   : > { %v1255_v35 = vadd.f32 %v3464_v24, %v1254_v34  ;;  %v1401_v36 = vmax.f32 %v1263_v32, 0.0 }
 0x1f6   : > { %v2816_v37 = vpop.f32.mrf.mxu1 }
 0x1f7   : > { %v1399_v39 = vmax.f32 %v1255_v35, 0.0  ;;  %v1445_v43 = vpack.c.bf16 %v1401_v36, %v1400_v40  ;;  %v1276_v48 = vadd.f32 %v2816_v37, %v3464_v24 }
 0x1f8   : > { %v1267_v41 = vpop.f32.mrf.mxu1 }
 0x1f9   : > { %v1444_v42 = vpack.c.bf16 %v1399_v39, %v1398_v38  ;;  %v1268_v45 = vadd.f32 %v3464_v24, %v1267_v41  ;;  %v1404_v56 = vmax.f32 %v1276_v48, 0.0 }
 0x1fa   : > { %v2817_v44 = vpop.f32.mrf.mxu1 }
 0x1fb   : > { %v1279_v47 = vadd.f32 %v2817_v44, %v3464_v24  ;;  %2890 = vmatprep.mubr.bf16.mxu0 %v1444_v42  ;;  %v1402_v54 = vmax.f32 %v1268_v45, 0.0 }
 0x1fc   : > { %v1270_v49 = vpop.f32.mrf.mxu1  ;;  %2891 = vmatmul.mubr.bf16.gmra.mxu0 %v1445_v43 }
 0x1fd   : > { %v1271_v51 = vadd.f32 %v3464_v24, %v1270_v49  ;;  %v1405_v52 = vmax.f32 %v1279_v47, 0.0 }
 0x1fe   : > { %v2820_v53 = vpop.f32.mrf.mxu1 }
 0x1ff   : > { %v1403_v55 = vmax.f32 %v1271_v51, 0.0  ;;  %v1447_v59 = vpack.c.bf16 %v1405_v52, %v1404_v56  ;;  %v1292_v63 = vadd.f32 %v2820_v53, %v3464_v24 }
 0x200   : > { %v1283_v57 = vpop.f32.mrf.mxu1 }
 0x201   : > { %v1446_v58 = vpack.c.bf16 %v1403_v55, %v1402_v54  ;;  %v1284_v61 = vadd.f32 %v3464_v24, %v1283_v57  ;;  %v1408_v6 = vmax.f32 %v1292_v63, 0.0 }
 0x202   : > { %v2821_v60 = vpop.f32.mrf.mxu1 }
 0x203   : > { %v1295_v62 = vadd.f32 %v2821_v60, %v3464_v24  ;;  %2894 = vmatprep.mubr.bf16.mxu0 %v1446_v58  ;;  %v1406_v4 = vmax.f32 %v1284_v61, 0.0 }
 0x204   : > { %v1286_v0 = vpop.f32.mrf.mxu1  ;;  %2895 = vmatmul.mubr.bf16.gmra.mxu0 %v1447_v59 }
 0x205   : > { %v1287_v1 = vadd.f32 %v3464_v24, %v1286_v0  ;;  %v1409_v2 = vmax.f32 %v1295_v62, 0.0 }
 0x206   : > { %v2824_v3 = vpop.f32.mrf.mxu1 }
 0x207   : > { %v1407_v5 = vmax.f32 %v1287_v1, 0.0  ;;  %v1449_v9 = vpack.c.bf16 %v1409_v2, %v1408_v6  ;;  %v1308_v13 = vadd.f32 %v2824_v3, %v3464_v24  ;;  %v3551_v3 = vld [vmem:[%s3810_s4 + $0x1] ss:$0 sm:$0xff] }
 0x208   : > { %v1299_v7 = vpop.f32.mrf.mxu1 }
 0x209   : > { %v1448_v8 = vpack.c.bf16 %v1407_v5, %v1406_v4  ;;  %v1300_v11 = vadd.f32 %v3464_v24, %v1299_v7  ;;  %v1412_v20 = vmax.f32 %v1308_v13, 0.0 }
 0x20a   : > { %v2825_v10 = vpop.f32.mrf.mxu1 }
 0x20b   : > { %v1311_v12 = vadd.f32 %v2825_v10, %v3464_v24  ;;  %2898 = vmatprep.mubr.bf16.mxu0 %v1448_v8  ;;  %v1410_v18 = vmax.f32 %v1300_v11, 0.0 }
 0x20c   : > { %v1302_v14 = vpop.f32.mrf.mxu1  ;;  %2899 = vmatmul.mubr.bf16.gmra.mxu0 %v1449_v9 }
 0x20d   : > { %v1303_v15 = vadd.f32 %v3464_v24, %v1302_v14  ;;  %v1413_v16 = vmax.f32 %v1311_v12, 0.0 }
 0x20e   : > { %v2828_v17 = vpop.f32.mrf.mxu1 }
 0x20f   : > { %v1411_v19 = vmax.f32 %v1303_v15, 0.0  ;;  %v1451_v46 = vpack.c.bf16 %v1413_v16, %v1412_v20  ;;  %v1324_v27 = vadd.f32 %v2828_v17, %v3464_v24 }
 0x210   : > { %v1315_v21 = vpop.f32.mrf.mxu1 }
 0x211   : > { %v1450_v22 = vpack.c.bf16 %v1411_v19, %v1410_v18  ;;  %v1316_v25 = vadd.f32 %v3464_v24, %v1315_v21  ;;  %v1416_v34 = vmax.f32 %v1324_v27, 0.0 }
 0x212   : > { %v2829_v23 = vpop.f32.mrf.mxu1 }
 0x213   : > { %v1327_v26 = vadd.f32 %v2829_v23, %v3464_v24  ;;  %2902 = vmatprep.mubr.bf16.mxu0 %v1450_v22  ;;  %v1414_v32 = vmax.f32 %v1316_v25, 0.0 }
 0x214   : > { %v1318_v28 = vpop.f32.mrf.mxu1  ;;  %2903 = vmatmul.mubr.bf16.gmra.mxu0 %v1451_v46 }
 0x215   : > { %v1319_v29 = vadd.f32 %v3464_v24, %v1318_v28  ;;  %v1417_v30 = vmax.f32 %v1327_v26, 0.0 }
 0x216   : > { %v2832_v31 = vpop.f32.mrf.mxu1 }
 0x217   : > { %v1415_v33 = vmax.f32 %v1319_v29, 0.0  ;;  %v1453_v37 = vpack.c.bf16 %v1417_v30, %v1416_v34  ;;  %v1340_v41 = vadd.f32 %v2832_v31, %v3464_v24 }
 0x218   : > { %v1331_v35 = vpop.f32.mrf.mxu1 }
 0x219   : > { %v1452_v36 = vpack.c.bf16 %v1415_v33, %v1414_v32  ;;  %v1332_v39 = vadd.f32 %v3464_v24, %v1331_v35  ;;  %v1420_v49 = vmax.f32 %v1340_v41, 0.0 }
 0x21a   : > { %v2833_v38 = vpop.f32.mrf.mxu1 }
 0x21b   : > { %v1343_v40 = vadd.f32 %v2833_v38, %v3464_v24  ;;  %2906 = vmatprep.mubr.bf16.mxu0 %v1452_v36  ;;  %v1418_v47 = vmax.f32 %v1332_v39, 0.0 }
 0x21c   : > { %v1334_v42 = vpop.f32.mrf.mxu1  ;;  %2907 = vmatmul.mubr.bf16.gmra.mxu0 %v1453_v37 }
 0x21d   : > { %v1335_v43 = vadd.f32 %v3464_v24, %v1334_v42  ;;  %v1421_v44 = vmax.f32 %v1343_v40, 0.0 }
 0x21e   : > { %v2836_v45 = vpop.f32.mrf.mxu1 }
 0x21f   : > { %v1419_v48 = vmax.f32 %v1335_v43, 0.0  ;;  %v1455_v52 = vpack.c.bf16 %v1421_v44, %v1420_v49  ;;  %v1356_v56 = vadd.f32 %v2836_v45, %v3464_v24 }
 0x220   : > { %v1347_v50 = vpop.f32.mrf.mxu1 }
 0x221   : > { %v1454_v51 = vpack.c.bf16 %v1419_v48, %v1418_v47  ;;  %v1348_v54 = vadd.f32 %v3464_v24, %v1347_v50  ;;  %v1424_v62 = vmax.f32 %v1356_v56, 0.0 }
 0x222   : > { %v2837_v53 = vpop.f32.mrf.mxu1 }
 0x223   : > { %v1359_v55 = vadd.f32 %v2837_v53, %v3464_v24  ;;  %2910 = vmatprep.mubr.bf16.mxu0 %v1454_v51  ;;  %v1422_v60 = vmax.f32 %v1348_v54, 0.0 }
 0x224   : > { %v1350_v57 = vpop.f32.mrf.mxu1  ;;  %2911 = vmatmul.mubr.bf16.gmra.mxu0 %v1455_v52 }
 0x225   : > { %v1351_v58 = vadd.f32 %v3464_v24, %v1350_v57  ;;  %v1425_v59 = vmax.f32 %v1359_v55, 0.0 }
 0x227   : > { %v1423_v61 = vmax.f32 %v1351_v58, 0.0  ;;  %v1457_v0 = vpack.c.bf16 %v1425_v59, %v1424_v62 }
 0x229   : > { %v1456_v63 = vpack.c.bf16 %v1423_v61, %v1422_v60 }
 0x22b   : > { %2914 = vmatprep.mubr.bf16.mxu0 %v1456_v63 }
 0x22c   : > { %2915 = vmatmul.mubr.bf16.gmra.mxu0 %v1457_v0 }
 0x274   : > { %v2856_v1 = vpop.f32.mrf.mxu0 }
 0x275   : > { %v1574_v6 = vadd.f32 %v2856_v1, %v3551_v3 }
 0x276   : > { %v1565_v2 = vpop.f32.mrf.mxu0 }
 0x277   : > { %v1566_v5 = vadd.f32 %v3551_v3, %v1565_v2  ;;  %v1822_v13 = vmax.f32 %v1574_v6, 0.0 }
 0x278   : > { %v2857_v4 = vpop.f32.mrf.mxu0 }
 0x279   : > { %v1577_v24 = vadd.f32 %v2857_v4, %v3551_v3  ;;  %v1820_v11 = vmax.f32 %v1566_v5, 0.0 }
 0x27a   : > { %v1568_v7 = vpop.f32.mrf.mxu0 }
 0x27b   : > { %v1569_v8 = vadd.f32 %v3551_v3, %v1568_v7  ;;  %v1823_v9 = vmax.f32 %v1577_v24, 0.0 }
 0x27c   : > { %v2860_v10 = vpop.f32.mrf.mxu0 }
 0x27d   : > { %v1821_v12 = vmax.f32 %v1569_v8, 0.0  ;;  %v1885_v16 = vpack.c.bf16 %v1823_v9, %v1822_v13  ;;  %v1590_v20 = vadd.f32 %v2860_v10, %v3551_v3 }
 0x27e   : > { %v1581_v14 = vpop.f32.mrf.mxu0 }
 0x27f   : > { %v1884_v15 = vpack.c.bf16 %v1821_v12, %v1820_v11  ;;  %v1582_v18 = vadd.f32 %v3551_v3, %v1581_v14  ;;  %v1826_v27 = vmax.f32 %v1590_v20, 0.0 }
 0x280   : > { %v2861_v17 = vpop.f32.mrf.mxu0 }
 0x281   : > { %v1593_v19 = vadd.f32 %v2861_v17, %v3551_v3  ;;  %2934 = vmatprep.mubr.bf16.mxu0 %v1884_v15  ;;  %v1824_v25 = vmax.f32 %v1582_v18, 0.0 }
 0x282   : > { %v1584_v21 = vpop.f32.mrf.mxu0  ;;  %2935 = vmatmul.mubr.bf16.vlgmr.msra.gmra.mxu0 %v1885_v16 }
 0x283   : > { %v1585_v22 = vadd.f32 %v3551_v3, %v1584_v21  ;;  %v1827_v46 = vmax.f32 %v1593_v19, 0.0 }
 0x284   : > { %v2864_v23 = vpop.f32.mrf.mxu0 }
 0x285   : > { %v1825_v26 = vmax.f32 %v1585_v22, 0.0  ;;  %v1887_v30 = vpack.c.bf16 %v1827_v46, %v1826_v27  ;;  %v1606_v34 = vadd.f32 %v2864_v23, %v3551_v3 }
 0x286   : > { %v1597_v28 = vpop.f32.mrf.mxu0 }
 0x287   : > { %v1886_v29 = vpack.c.bf16 %v1825_v26, %v1824_v25  ;;  %v1598_v32 = vadd.f32 %v3551_v3, %v1597_v28  ;;  %v1830_v41 = vmax.f32 %v1606_v34, 0.0 }
 0x288   : > { %v2865_v31 = vpop.f32.mrf.mxu0 }
 0x289   : > { %v1609_v33 = vadd.f32 %v2865_v31, %v3551_v3  ;;  %2938 = vmatprep.mubr.bf16.mxu1 %v1886_v29  ;;  %v1828_v39 = vmax.f32 %v1598_v32, 0.0 }
 0x28a   : > { %v1600_v35 = vpop.f32.mrf.mxu0  ;;  %2939 = vmatmul.mubr.bf16.vlgmr.msra.gmra.mxu1 %v1887_v30 }
 0x28b   : > { %v1601_v36 = vadd.f32 %v3551_v3, %v1600_v35  ;;  %v1831_v37 = vmax.f32 %v1609_v33, 0.0 }
 0x28c   : > { %v2868_v38 = vpop.f32.mrf.mxu0 }
 0x28d   : > { %v1829_v40 = vmax.f32 %v1601_v36, 0.0  ;;  %v1889_v44 = vpack.c.bf16 %v1831_v37, %v1830_v41  ;;  %v1622_v49 = vadd.f32 %v2868_v38, %v3551_v3 }
 0x28e   : > { %v1613_v42 = vpop.f32.mrf.mxu0 }
 0x28f   : > { %v1888_v43 = vpack.c.bf16 %v1829_v40, %v1828_v39  ;;  %v1614_v47 = vadd.f32 %v3551_v3, %v1613_v42  ;;  %v1834_v56 = vmax.f32 %v1622_v49, 0.0 }
 0x290   : > { %v2869_v45 = vpop.f32.mrf.mxu0 }
 0x291   : > { %v1625_v48 = vadd.f32 %v2869_v45, %v3551_v3  ;;  %2942 = vmatprep.mubr.bf16.mxu1 %v1888_v43  ;;  %v1832_v54 = vmax.f32 %v1614_v47, 0.0 }
 0x292   : > { %v1616_v50 = vpop.f32.mrf.mxu0  ;;  %2943 = vmatmul.mubr.bf16.gmra.mxu1 %v1889_v44 }
 0x293   : > { %v1617_v51 = vadd.f32 %v3551_v3, %v1616_v50  ;;  %v1835_v52 = vmax.f32 %v1625_v48, 0.0 }
 0x294   : > { %v2872_v53 = vpop.f32.mrf.mxu0 }
 0x295   : > { %v1833_v55 = vmax.f32 %v1617_v51, 0.0  ;;  %v1891_v59 = vpack.c.bf16 %v1835_v52, %v1834_v56  ;;  %v1638_v63 = vadd.f32 %v2872_v53, %v3551_v3 }
 0x296   : > { %v1629_v57 = vpop.f32.mrf.mxu0 }
 0x297   : > { %v1890_v58 = vpack.c.bf16 %v1833_v55, %v1832_v54  ;;  %v1630_v61 = vadd.f32 %v3551_v3, %v1629_v57  ;;  %v1838_v6 = vmax.f32 %v1638_v63, 0.0 }
 0x298   : > { %v2873_v60 = vpop.f32.mrf.mxu0 }
 0x299   : > { %v1641_v62 = vadd.f32 %v2873_v60, %v3551_v3  ;;  %2946 = vmatprep.mubr.bf16.mxu1 %v1890_v58  ;;  %v1836_v5 = vmax.f32 %v1630_v61, 0.0 }
 0x29a   : > { %v1632_v0 = vpop.f32.mrf.mxu0  ;;  %2947 = vmatmul.mubr.bf16.gmra.mxu1 %v1891_v59 }
 0x29b   : > { %v1633_v1 = vadd.f32 %v3551_v3, %v1632_v0  ;;  %v1839_v2 = vmax.f32 %v1641_v62, 0.0 }
 0x29c   : > { %v2876_v4 = vpop.f32.mrf.mxu0 }
 0x29d   : > { %v1837_v24 = vmax.f32 %v1633_v1, 0.0  ;;  %v1893_v9 = vpack.c.bf16 %v1839_v2, %v1838_v6  ;;  %v1654_v13 = vadd.f32 %v2876_v4, %v3551_v3 }
 0x29e   : > { %v1645_v7 = vpop.f32.mrf.mxu0 }
 0x29f   : > { %v1892_v8 = vpack.c.bf16 %v1837_v24, %v1836_v5  ;;  %v1646_v11 = vadd.f32 %v3551_v3, %v1645_v7  ;;  %v1842_v20 = vmax.f32 %v1654_v13, 0.0 }
 0x2a0   : > { %v2877_v10 = vpop.f32.mrf.mxu0 }
 0x2a1   : > { %v1657_v12 = vadd.f32 %v2877_v10, %v3551_v3  ;;  %2950 = vmatprep.mubr.bf16.mxu1 %v1892_v8  ;;  %v1840_v18 = vmax.f32 %v1646_v11, 0.0 }
 0x2a2   : > { %v1648_v14 = vpop.f32.mrf.mxu0  ;;  %2951 = vmatmul.mubr.bf16.gmra.mxu1 %v1893_v9 }
 0x2a3   : > { %v1649_v15 = vadd.f32 %v3551_v3, %v1648_v14  ;;  %v1843_v16 = vmax.f32 %v1657_v12, 0.0 }
 0x2a4   : > { %v2880_v17 = vpop.f32.mrf.mxu0 }
 0x2a5   : > { %v1841_v19 = vmax.f32 %v1649_v15, 0.0  ;;  %v1895_v46 = vpack.c.bf16 %v1843_v16, %v1842_v20  ;;  %v1670_v27 = vadd.f32 %v2880_v17, %v3551_v3 }
 0x2a6   : > { %v1661_v21 = vpop.f32.mrf.mxu0 }
 0x2a7   : > { %v1894_v22 = vpack.c.bf16 %v1841_v19, %v1840_v18  ;;  %v1662_v25 = vadd.f32 %v3551_v3, %v1661_v21  ;;  %v1846_v34 = vmax.f32 %v1670_v27, 0.0 }
 0x2a8   : > { %v2881_v23 = vpop.f32.mrf.mxu0 }
 0x2a9   : > { %v1673_v26 = vadd.f32 %v2881_v23, %v3551_v3  ;;  %2954 = vmatprep.mubr.bf16.mxu1 %v1894_v22  ;;  %v1844_v32 = vmax.f32 %v1662_v25, 0.0 }
 0x2aa   : > { %v1664_v28 = vpop.f32.mrf.mxu0  ;;  %2955 = vmatmul.mubr.bf16.gmra.mxu1 %v1895_v46 }
 0x2ab   : > { %v1665_v29 = vadd.f32 %v3551_v3, %v1664_v28  ;;  %v1847_v30 = vmax.f32 %v1673_v26, 0.0 }
 0x2ac   : > { %v2884_v31 = vpop.f32.mrf.mxu0 }
 0x2ad   : > { %v1845_v33 = vmax.f32 %v1665_v29, 0.0  ;;  %v1897_v37 = vpack.c.bf16 %v1847_v30, %v1846_v34  ;;  %v1686_v41 = vadd.f32 %v2884_v31, %v3551_v3 }
 0x2ae   : > { %v1677_v35 = vpop.f32.mrf.mxu0 }
 0x2af   : > { %v1896_v36 = vpack.c.bf16 %v1845_v33, %v1844_v32  ;;  %v1678_v39 = vadd.f32 %v3551_v3, %v1677_v35  ;;  %v1850_v49 = vmax.f32 %v1686_v41, 0.0 }
 0x2b0   : > { %v2885_v38 = vpop.f32.mrf.mxu0 }
 0x2b1   : > { %v1689_v40 = vadd.f32 %v2885_v38, %v3551_v3  ;;  %2958 = vmatprep.mubr.bf16.mxu1 %v1896_v36  ;;  %v1848_v47 = vmax.f32 %v1678_v39, 0.0 }
 0x2b2   : > { %v1680_v42 = vpop.f32.mrf.mxu0  ;;  %2959 = vmatmul.mubr.bf16.gmra.mxu1 %v1897_v37 }
 0x2b3   : > { %v1681_v43 = vadd.f32 %v3551_v3, %v1680_v42  ;;  %v1851_v44 = vmax.f32 %v1689_v40, 0.0 }
 0x2b4   : > { %v2888_v45 = vpop.f32.mrf.mxu0 }
 0x2b5   : > { %v1849_v48 = vmax.f32 %v1681_v43, 0.0  ;;  %v1899_v52 = vpack.c.bf16 %v1851_v44, %v1850_v49  ;;  %v1702_v56 = vadd.f32 %v2888_v45, %v3551_v3 }
 0x2b6   : > { %v1693_v50 = vpop.f32.mrf.mxu0 }
 0x2b7   : > { %v1898_v51 = vpack.c.bf16 %v1849_v48, %v1848_v47  ;;  %v1694_v54 = vadd.f32 %v3551_v3, %v1693_v50  ;;  %v1854_v63 = vmax.f32 %v1702_v56, 0.0 }
 0x2b8   : > { %v2889_v53 = vpop.f32.mrf.mxu0 }
 0x2b9   : > { %v1705_v55 = vadd.f32 %v2889_v53, %v3551_v3  ;;  %2962 = vmatprep.mubr.bf16.mxu1 %v1898_v51  ;;  %v1852_v61 = vmax.f32 %v1694_v54, 0.0 }
 0x2ba   : > { %v1696_v57 = vpop.f32.mrf.mxu0  ;;  %2963 = vmatmul.mubr.bf16.gmra.mxu1 %v1899_v52 }
 0x2bb   : > { %v1697_v58 = vadd.f32 %v3551_v3, %v1696_v57  ;;  %v1855_v59 = vmax.f32 %v1705_v55, 0.0 }
 0x2bc   : > { %v2892_v60 = vpop.f32.mrf.mxu0 }
 0x2bd   : > { %v1853_v62 = vmax.f32 %v1697_v58, 0.0  ;;  %v1901_v2 = vpack.c.bf16 %v1855_v59, %v1854_v63  ;;  %v1718_v6 = vadd.f32 %v2892_v60, %v3551_v3 }
 0x2be   : > { %v1709_v0 = vpop.f32.mrf.mxu0 }
 0x2bf   : > { %v1900_v1 = vpack.c.bf16 %v1853_v62, %v1852_v61  ;;  %v1710_v5 = vadd.f32 %v3551_v3, %v1709_v0  ;;  %v1858_v13 = vmax.f32 %v1718_v6, 0.0 }
 0x2c0   : > { %v2893_v4 = vpop.f32.mrf.mxu0 }
 0x2c1   : > { %v1721_v24 = vadd.f32 %v2893_v4, %v3551_v3  ;;  %2966 = vmatprep.mubr.bf16.mxu1 %v1900_v1  ;;  %v1856_v11 = vmax.f32 %v1710_v5, 0.0 }
 0x2c2   : > { %v1712_v7 = vpop.f32.mrf.mxu0  ;;  %2967 = vmatmul.mubr.bf16.gmra.mxu1 %v1901_v2 }
 0x2c3   : > { %v1713_v8 = vadd.f32 %v3551_v3, %v1712_v7  ;;  %v1859_v9 = vmax.f32 %v1721_v24, 0.0 }
 0x2c4   : > { %v2896_v10 = vpop.f32.mrf.mxu0 }
 0x2c5   : > { %v1857_v12 = vmax.f32 %v1713_v8, 0.0  ;;  %v1903_v16 = vpack.c.bf16 %v1859_v9, %v1858_v13  ;;  %v1734_v20 = vadd.f32 %v2896_v10, %v3551_v3 }
 0x2c6   : > { %v1725_v14 = vpop.f32.mrf.mxu0 }
 0x2c7   : > { %v1902_v15 = vpack.c.bf16 %v1857_v12, %v1856_v11  ;;  %v1726_v18 = vadd.f32 %v3551_v3, %v1725_v14  ;;  %v1862_v27 = vmax.f32 %v1734_v20, 0.0 }
 0x2c8   : > { %v2897_v17 = vpop.f32.mrf.mxu0 }
 0x2c9   : > { %v1737_v19 = vadd.f32 %v2897_v17, %v3551_v3  ;;  %2970 = vmatprep.mubr.bf16.mxu1 %v1902_v15  ;;  %v1860_v25 = vmax.f32 %v1726_v18, 0.0 }
 0x2ca   : > { %v1728_v21 = vpop.f32.mrf.mxu0  ;;  %2971 = vmatmul.mubr.bf16.gmra.mxu1 %v1903_v16 }
 0x2cb   : > { %v1729_v22 = vadd.f32 %v3551_v3, %v1728_v21  ;;  %v1863_v46 = vmax.f32 %v1737_v19, 0.0 }
 0x2cc   : > { %v2900_v23 = vpop.f32.mrf.mxu0 }
 0x2cd   : > { %v1861_v26 = vmax.f32 %v1729_v22, 0.0  ;;  %v1905_v30 = vpack.c.bf16 %v1863_v46, %v1862_v27  ;;  %v1750_v34 = vadd.f32 %v2900_v23, %v3551_v3 }
 0x2ce   : > { %v1741_v28 = vpop.f32.mrf.mxu0 }
 0x2cf   : > { %v1904_v29 = vpack.c.bf16 %v1861_v26, %v1860_v25  ;;  %v1742_v32 = vadd.f32 %v3551_v3, %v1741_v28  ;;  %v1866_v41 = vmax.f32 %v1750_v34, 0.0 }
 0x2d0   : > { %v2901_v31 = vpop.f32.mrf.mxu0 }
 0x2d1   : > { %v1753_v33 = vadd.f32 %v2901_v31, %v3551_v3  ;;  %2974 = vmatprep.mubr.bf16.mxu1 %v1904_v29  ;;  %v1864_v39 = vmax.f32 %v1742_v32, 0.0 }
 0x2d2   : > { %v1744_v35 = vpop.f32.mrf.mxu0  ;;  %2975 = vmatmul.mubr.bf16.gmra.mxu1 %v1905_v30 }
 0x2d3   : > { %v1745_v36 = vadd.f32 %v3551_v3, %v1744_v35  ;;  %v1867_v37 = vmax.f32 %v1753_v33, 0.0 }
 0x2d4   : > { %v2904_v38 = vpop.f32.mrf.mxu0 }
 0x2d5   : > { %v1865_v40 = vmax.f32 %v1745_v36, 0.0  ;;  %v1907_v44 = vpack.c.bf16 %v1867_v37, %v1866_v41  ;;  %v1766_v49 = vadd.f32 %v2904_v38, %v3551_v3  ;;  %v3623_v36 = vld [vmem:[%s3812_s6] ss:$0 sm:$0xff] }
 0x2d6   : > { %v1757_v42 = vpop.f32.mrf.mxu0 }
 0x2d7   : > { %v1906_v43 = vpack.c.bf16 %v1865_v40, %v1864_v39  ;;  %v1758_v47 = vadd.f32 %v3551_v3, %v1757_v42  ;;  %v1870_v56 = vmax.f32 %v1766_v49, 0.0 }
 0x2d8   : > { %v2905_v45 = vpop.f32.mrf.mxu0 }
 0x2d9   : > { %v1769_v48 = vadd.f32 %v2905_v45, %v3551_v3  ;;  %2978 = vmatprep.mubr.bf16.mxu1 %v1906_v43  ;;  %v1868_v54 = vmax.f32 %v1758_v47, 0.0 }
 0x2da   : > { %v1760_v50 = vpop.f32.mrf.mxu0  ;;  %2979 = vmatmul.mubr.bf16.gmra.mxu1 %v1907_v44 }
 0x2db   : > { %v1761_v51 = vadd.f32 %v3551_v3, %v1760_v50  ;;  %v1871_v52 = vmax.f32 %v1769_v48, 0.0 }
 0x2dc   : > { %v2908_v53 = vpop.f32.mrf.mxu0 }
 0x2dd   : > { %v1869_v55 = vmax.f32 %v1761_v51, 0.0  ;;  %v1909_v59 = vpack.c.bf16 %v1871_v52, %v1870_v56  ;;  %v1782_v63 = vadd.f32 %v2908_v53, %v3551_v3 }
 0x2de   : > { %v1773_v57 = vpop.f32.mrf.mxu0 }
 0x2df   : > { %v1908_v58 = vpack.c.bf16 %v1869_v55, %v1868_v54  ;;  %v1774_v61 = vadd.f32 %v3551_v3, %v1773_v57  ;;  %v1874_v6 = vmax.f32 %v1782_v63, 0.0 }
 0x2e0   : > { %v2909_v60 = vpop.f32.mrf.mxu0 }
 0x2e1   : > { %v1785_v62 = vadd.f32 %v2909_v60, %v3551_v3  ;;  %2982 = vmatprep.mubr.bf16.mxu1 %v1908_v58  ;;  %v1872_v5 = vmax.f32 %v1774_v61, 0.0 }
 0x2e2   : > { %v1776_v0 = vpop.f32.mrf.mxu0  ;;  %2983 = vmatmul.mubr.bf16.gmra.mxu1 %v1909_v59 }
 0x2e3   : > { %v1777_v1 = vadd.f32 %v3551_v3, %v1776_v0  ;;  %v1875_v2 = vmax.f32 %v1785_v62, 0.0 }
 0x2e4   : > { %v2912_v4 = vpop.f32.mrf.mxu0 }
 0x2e5   : > { %v1873_v24 = vmax.f32 %v1777_v1, 0.0  ;;  %v1911_v9 = vpack.c.bf16 %v1875_v2, %v1874_v6  ;;  %v1798_v13 = vadd.f32 %v2912_v4, %v3551_v3 }
 0x2e6   : > { %v1789_v7 = vpop.f32.mrf.mxu0 }
 0x2e7   : > { %v1910_v8 = vpack.c.bf16 %v1873_v24, %v1872_v5  ;;  %v1790_v11 = vadd.f32 %v3551_v3, %v1789_v7  ;;  %v1878_v20 = vmax.f32 %v1798_v13, 0.0 }
 0x2e8   : > { %v2913_v10 = vpop.f32.mrf.mxu0 }
 0x2e9   : > { %v1801_v12 = vadd.f32 %v2913_v10, %v3551_v3  ;;  %2986 = vmatprep.mubr.bf16.mxu1 %v1910_v8  ;;  %v1876_v18 = vmax.f32 %v1790_v11, 0.0 }
 0x2ea   : > { %v1792_v14 = vpop.f32.mrf.mxu0  ;;  %2987 = vmatmul.mubr.bf16.gmra.mxu1 %v1911_v9 }
 0x2eb   : > { %v1793_v15 = vadd.f32 %v3551_v3, %v1792_v14  ;;  %v1879_v16 = vmax.f32 %v1801_v12, 0.0 }
 0x2ec   : > { %v2916_v17 = vpop.f32.mrf.mxu0 }
 0x2ed   : > { %v1877_v19 = vmax.f32 %v1793_v15, 0.0  ;;  %v1913_v46 = vpack.c.bf16 %v1879_v16, %v1878_v20  ;;  %v1814_v27 = vadd.f32 %v2916_v17, %v3551_v3 }
 0x2ee   : > { %v1805_v21 = vpop.f32.mrf.mxu0 }
 0x2ef   : > { %v1912_v22 = vpack.c.bf16 %v1877_v19, %v1876_v18  ;;  %v1806_v25 = vadd.f32 %v3551_v3, %v1805_v21  ;;  %v1882_v33 = vmax.f32 %v1814_v27, 0.0 }
 0x2f0   : > { %v2917_v23 = vpop.f32.mrf.mxu0 }
 0x2f1   : > { %v1817_v26 = vadd.f32 %v2917_v23, %v3551_v3  ;;  %2990 = vmatprep.mubr.bf16.mxu1 %v1912_v22  ;;  %v1880_v31 = vmax.f32 %v1806_v25, 0.0 }
 0x2f2   : > { %v1808_v28 = vpop.f32.mrf.mxu0  ;;  %2991 = vmatmul.mubr.bf16.gmra.mxu1 %v1913_v46 }
 0x2f3   : > { %v1809_v29 = vadd.f32 %v3551_v3, %v1808_v28  ;;  %v1883_v30 = vmax.f32 %v1817_v26, 0.0 }
 0x2f5   : > { %v1881_v32 = vmax.f32 %v1809_v29, 0.0  ;;  %v1915_v35 = vpack.c.bf16 %v1883_v30, %v1882_v33 }
 0x2f7   : > { %v1914_v34 = vpack.c.bf16 %v1881_v32, %v1880_v31 }
 0x2f9   : > { %2994 = vmatprep.mubr.bf16.mxu1 %v1914_v34 }
 0x2fa   : > { %2995 = vmatmul.mubr.bf16.gmra.mxu1 %v1915_v35 }
 0x342   : > { %v2936_v37 = vpop.f32.mrf.mxu0 }
 0x343   : > { %v2030_v38 = vadd.f32 %v2936_v37, %v3623_v36 }
 0x344   : > { %v2021_v3 = vpop.f32.mrf.mxu0 }
 0x345   : > { %2278 = vst [vmem:[%s3626_s22 + $0x10] sm:$0xff] %v2030_v38  ;;  %v2022_v39 = vadd.f32 %v3623_v36, %v2021_v3 }
 0x346   : > { %v2937_v40 = vpop.f32.mrf.mxu0 }
 0x347   : > { %2276 = vst [vmem:[%s3626_s22] sm:$0xff] %v2022_v39  ;;  %v2033_v41 = vadd.f32 %v2937_v40, %v3623_v36 }
 0x348   : > { %v2024_v42 = vpop.f32.mrf.mxu0 }
 0x349   : > { %2279 = vst [vmem:[%s3626_s22 + $0x18] sm:$0xff] %v2033_v41  ;;  %v2025_v43 = vadd.f32 %v3623_v36, %v2024_v42 }
 0x34a   : > { %v2940_v44 = vpop.f32.mrf.mxu1 }
 0x34b   : > { %2277 = vst [vmem:[%s3626_s22 + $0x8] sm:$0xff] %v2025_v43  ;;  %v2046_v45 = vadd.f32 %v2940_v44, %v3623_v36 }
 0x34c   : > { %v2037_v47 = vpop.f32.mrf.mxu1 }
 0x34d   : > { %2282 = vst [vmem:[%s3626_s22 + $0x30] sm:$0xff] %v2046_v45  ;;  %v2038_v48 = vadd.f32 %v3623_v36, %v2037_v47 }
 0x34e   : > { %v2941_v49 = vpop.f32.mrf.mxu1 }
 0x34f   : > { %2280 = vst [vmem:[%s3626_s22 + $0x20] sm:$0xff] %v2038_v48  ;;  %v2049_v50 = vadd.f32 %v2941_v49, %v3623_v36 }
 0x350   : > { %v2040_v51 = vpop.f32.mrf.mxu1 }
 0x351   : > { %2283 = vst [vmem:[%s3626_s22 + $0x38] sm:$0xff] %v2049_v50  ;;  %v2041_v52 = vadd.f32 %v3623_v36, %v2040_v51 }
 0x352   : > { %v2944_v53 = vpop.f32.mrf.mxu1 }
 0x353   : > { %2281 = vst [vmem:[%s3626_s22 + $0x28] sm:$0xff] %v2041_v52  ;;  %v2062_v54 = vadd.f32 %v2944_v53, %v3623_v36 }
 0x354   : > { %v2053_v55 = vpop.f32.mrf.mxu1 }
 0x355   : > { %2286 = vst [vmem:[%s3626_s22 + $0x50] sm:$0xff] %v2062_v54  ;;  %v2054_v56 = vadd.f32 %v3623_v36, %v2053_v55 }
 0x356   : > { %v2945_v57 = vpop.f32.mrf.mxu1 }
 0x357   : > { %2284 = vst [vmem:[%s3626_s22 + $0x40] sm:$0xff] %v2054_v56  ;;  %v2065_v58 = vadd.f32 %v2945_v57, %v3623_v36 }
 0x358   : > { %v2056_v59 = vpop.f32.mrf.mxu1 }
 0x359   : > { %2287 = vst [vmem:[%s3626_s22 + $0x58] sm:$0xff] %v2065_v58  ;;  %v2057_v60 = vadd.f32 %v3623_v36, %v2056_v59 }
 0x35a   : > { %v2948_v61 = vpop.f32.mrf.mxu1 }
 0x35b   : > { %2285 = vst [vmem:[%s3626_s22 + $0x48] sm:$0xff] %v2057_v60  ;;  %v2078_v62 = vadd.f32 %v2948_v61, %v3623_v36 }
 0x35c   : > { %v2069_v63 = vpop.f32.mrf.mxu1 }
 0x35d   : > { %2290 = vst [vmem:[%s3626_s22 + $0x70] sm:$0xff] %v2078_v62  ;;  %v2070_v0 = vadd.f32 %v3623_v36, %v2069_v63 }
 0x35e   : > { %v2949_v1 = vpop.f32.mrf.mxu1 }
 0x35f   : > { %2288 = vst [vmem:[%s3626_s22 + $0x60] sm:$0xff] %v2070_v0  ;;  %v2081_v2 = vadd.f32 %v2949_v1, %v3623_v36 }
 0x360   : > { %v2072_v4 = vpop.f32.mrf.mxu1 }
 0x361   : > { %2291 = vst [vmem:[%s3626_s22 + $0x78] sm:$0xff] %v2081_v2  ;;  %v2073_v5 = vadd.f32 %v3623_v36, %v2072_v4 }
 0x362   : > { %v2952_v24 = vpop.f32.mrf.mxu1 }
 0x363   : > { %2289 = vst [vmem:[%s3626_s22 + $0x68] sm:$0xff] %v2073_v5  ;;  %v2094_v6 = vadd.f32 %v2952_v24, %v3623_v36 }
 0x364   : > { %v2085_v7 = vpop.f32.mrf.mxu1 }
 0x365   : > { %2294 = vst [vmem:[%s3626_s22 + $0x90] sm:$0xff] %v2094_v6  ;;  %v2086_v8 = vadd.f32 %v3623_v36, %v2085_v7 }
 0x366   : > { %v2953_v9 = vpop.f32.mrf.mxu1 }
 0x367   : > { %2292 = vst [vmem:[%s3626_s22 + $0x80] sm:$0xff] %v2086_v8  ;;  %v2097_v10 = vadd.f32 %v2953_v9, %v3623_v36 }
 0x368   : > { %v2088_v11 = vpop.f32.mrf.mxu1 }
 0x369   : > { %2295 = vst [vmem:[%s3626_s22 + $0x98] sm:$0xff] %v2097_v10  ;;  %v2089_v12 = vadd.f32 %v3623_v36, %v2088_v11 }
 0x36a   : > { %v2956_v13 = vpop.f32.mrf.mxu1 }
 0x36b   : > { %2293 = vst [vmem:[%s3626_s22 + $0x88] sm:$0xff] %v2089_v12  ;;  %v2110_v14 = vadd.f32 %v2956_v13, %v3623_v36 }
 0x36c   : > { %v2101_v15 = vpop.f32.mrf.mxu1 }
 0x36d   : > { %2298 = vst [vmem:[%s3626_s22 + $0xb0] sm:$0xff] %v2110_v14  ;;  %v2102_v16 = vadd.f32 %v3623_v36, %v2101_v15 }
 0x36e   : > { %v2957_v17 = vpop.f32.mrf.mxu1 }
 0x36f   : > { %2296 = vst [vmem:[%s3626_s22 + $0xa0] sm:$0xff] %v2102_v16  ;;  %v2113_v18 = vadd.f32 %v2957_v17, %v3623_v36 }
 0x370   : > { %v2104_v19 = vpop.f32.mrf.mxu1 }
 0x371   : > { %2299 = vst [vmem:[%s3626_s22 + $0xb8] sm:$0xff] %v2113_v18  ;;  %v2105_v20 = vadd.f32 %v3623_v36, %v2104_v19 }
 0x372   : > { %v2960_v21 = vpop.f32.mrf.mxu1 }
 0x373   : > { %2297 = vst [vmem:[%s3626_s22 + $0xa8] sm:$0xff] %v2105_v20  ;;  %v2126_v22 = vadd.f32 %v2960_v21, %v3623_v36 }
 0x374   : > { %v2117_v46 = vpop.f32.mrf.mxu1 }
 0x375   : > { %2302 = vst [vmem:[%s3626_s22 + $0xd0] sm:$0xff] %v2126_v22  ;;  %v2118_v23 = vadd.f32 %v3623_v36, %v2117_v46 }
 0x376   : > { %v2961_v25 = vpop.f32.mrf.mxu1 }
 0x377   : > { %2300 = vst [vmem:[%s3626_s22 + $0xc0] sm:$0xff] %v2118_v23  ;;  %v2129_v26 = vadd.f32 %v2961_v25, %v3623_v36 }
 0x378   : > { %v2120_v27 = vpop.f32.mrf.mxu1 }
 0x379   : > { %2303 = vst [vmem:[%s3626_s22 + $0xd8] sm:$0xff] %v2129_v26  ;;  %v2121_v28 = vadd.f32 %v3623_v36, %v2120_v27 }
 0x37a   : > { %v2964_v29 = vpop.f32.mrf.mxu1 }
 0x37b   : > { %2301 = vst [vmem:[%s3626_s22 + $0xc8] sm:$0xff] %v2121_v28  ;;  %v2142_v30 = vadd.f32 %v2964_v29, %v3623_v36 }
 0x37c   : > { %v2133_v31 = vpop.f32.mrf.mxu1 }
 0x37d   : > { %2306 = vst [vmem:[%s3626_s22 + $0xf0] sm:$0xff] %v2142_v30  ;;  %v2134_v32 = vadd.f32 %v3623_v36, %v2133_v31 }
 0x37e   : > { %v2965_v33 = vpop.f32.mrf.mxu1 }
 0x37f   : > { %2304 = vst [vmem:[%s3626_s22 + $0xe0] sm:$0xff] %v2134_v32  ;;  %v2145_v34 = vadd.f32 %v2965_v33, %v3623_v36 }
 0x380   : > { %v2136_v35 = vpop.f32.mrf.mxu1 }
 0x381   : > { %2307 = vst [vmem:[%s3626_s22 + $0xf8] sm:$0xff] %v2145_v34  ;;  %v2137_v37 = vadd.f32 %v3623_v36, %v2136_v35 }
 0x382   : > { %v2968_v38 = vpop.f32.mrf.mxu1 }
 0x383   : > { %2305 = vst [vmem:[%s3626_s22 + $0xe8] sm:$0xff] %v2137_v37  ;;  %v2158_v3 = vadd.f32 %v2968_v38, %v3623_v36 }
 0x384   : > { %v2149_v39 = vpop.f32.mrf.mxu1 }
 0x385   : > { %2310 = vst [vmem:[%s3626_s22 + $0x110] sm:$0xff] %v2158_v3  ;;  %v2150_v40 = vadd.f32 %v3623_v36, %v2149_v39 }
 0x386   : > { %v2969_v41 = vpop.f32.mrf.mxu1 }
 0x387   : > { %2308 = vst [vmem:[%s3626_s22 + $0x100] sm:$0xff] %v2150_v40  ;;  %v2161_v42 = vadd.f32 %v2969_v41, %v3623_v36 }
 0x388   : > { %v2152_v43 = vpop.f32.mrf.mxu1 }
 0x389   : > { %2311 = vst [vmem:[%s3626_s22 + $0x118] sm:$0xff] %v2161_v42  ;;  %v2153_v44 = vadd.f32 %v3623_v36, %v2152_v43 }
 0x38a   : > { %v2972_v45 = vpop.f32.mrf.mxu1 }
 0x38b   : > { %2309 = vst [vmem:[%s3626_s22 + $0x108] sm:$0xff] %v2153_v44  ;;  %v2174_v47 = vadd.f32 %v2972_v45, %v3623_v36 }
 0x38c   : > { %v2165_v48 = vpop.f32.mrf.mxu1 }
 0x38d   : > { %2314 = vst [vmem:[%s3626_s22 + $0x130] sm:$0xff] %v2174_v47  ;;  %v2166_v49 = vadd.f32 %v3623_v36, %v2165_v48 }
 0x38e   : > { %v2973_v50 = vpop.f32.mrf.mxu1 }
 0x38f   : > { %2312 = vst [vmem:[%s3626_s22 + $0x120] sm:$0xff] %v2166_v49  ;;  %v2177_v51 = vadd.f32 %v2973_v50, %v3623_v36 }
 0x390   : > { %v2168_v52 = vpop.f32.mrf.mxu1 }
 0x391   : > { %2315 = vst [vmem:[%s3626_s22 + $0x138] sm:$0xff] %v2177_v51  ;;  %v2169_v53 = vadd.f32 %v3623_v36, %v2168_v52 }
 0x392   : > { %v2976_v54 = vpop.f32.mrf.mxu1 }
 0x393   : > { %2313 = vst [vmem:[%s3626_s22 + $0x128] sm:$0xff] %v2169_v53  ;;  %v2190_v55 = vadd.f32 %v2976_v54, %v3623_v36 }
 0x394   : > { %v2181_v56 = vpop.f32.mrf.mxu1 }
 0x395   : > { %2318 = vst [vmem:[%s3626_s22 + $0x150] sm:$0xff] %v2190_v55  ;;  %v2182_v57 = vadd.f32 %v3623_v36, %v2181_v56 }
 0x396   : > { %v2977_v58 = vpop.f32.mrf.mxu1 }
 0x397   : > { %2316 = vst [vmem:[%s3626_s22 + $0x140] sm:$0xff] %v2182_v57  ;;  %v2193_v59 = vadd.f32 %v2977_v58, %v3623_v36 }
 0x398   : > { %v2184_v60 = vpop.f32.mrf.mxu1 }
 0x399   : > { %2319 = vst [vmem:[%s3626_s22 + $0x158] sm:$0xff] %v2193_v59  ;;  %v2185_v61 = vadd.f32 %v3623_v36, %v2184_v60 }
 0x39a   : > { %v2980_v62 = vpop.f32.mrf.mxu1 }
 0x39b   : > { %2317 = vst [vmem:[%s3626_s22 + $0x148] sm:$0xff] %v2185_v61  ;;  %v2206_v63 = vadd.f32 %v2980_v62, %v3623_v36 }
 0x39c   : > { %v2197_v0 = vpop.f32.mrf.mxu1 }
 0x39d   : > { %2322 = vst [vmem:[%s3626_s22 + $0x170] sm:$0xff] %v2206_v63  ;;  %v2198_v1 = vadd.f32 %v3623_v36, %v2197_v0 }
 0x39e   : > { %v2981_v2 = vpop.f32.mrf.mxu1 }
 0x39f   : > { %2320 = vst [vmem:[%s3626_s22 + $0x160] sm:$0xff] %v2198_v1  ;;  %v2209_v4 = vadd.f32 %v2981_v2, %v3623_v36 }
 0x3a0   : > { %v2200_v5 = vpop.f32.mrf.mxu1 }
 0x3a1   : > { %2323 = vst [vmem:[%s3626_s22 + $0x178] sm:$0xff] %v2209_v4  ;;  %v2201_v24 = vadd.f32 %v3623_v36, %v2200_v5 }
 0x3a2   : > { %v2984_v6 = vpop.f32.mrf.mxu1 }
 0x3a3   : > { %2321 = vst [vmem:[%s3626_s22 + $0x168] sm:$0xff] %v2201_v24  ;;  %v2222_v7 = vadd.f32 %v2984_v6, %v3623_v36 }
 0x3a4   : > { %v2213_v8 = vpop.f32.mrf.mxu1 }
 0x3a5   : > { %2326 = vst [vmem:[%s3626_s22 + $0x190] sm:$0xff] %v2222_v7  ;;  %v2214_v9 = vadd.f32 %v3623_v36, %v2213_v8 }
 0x3a6   : > { %v2985_v10 = vpop.f32.mrf.mxu1 }
 0x3a7   : > { %2324 = vst [vmem:[%s3626_s22 + $0x180] sm:$0xff] %v2214_v9  ;;  %v2225_v11 = vadd.f32 %v2985_v10, %v3623_v36 }
 0x3a8   : > { %v2216_v12 = vpop.f32.mrf.mxu1 }
 0x3a9   : > { %2327 = vst [vmem:[%s3626_s22 + $0x198] sm:$0xff] %v2225_v11  ;;  %v2217_v13 = vadd.f32 %v3623_v36, %v2216_v12 }
 0x3aa   : > { %v2988_v14 = vpop.f32.mrf.mxu1 }
 0x3ab   : > { %2325 = vst [vmem:[%s3626_s22 + $0x188] sm:$0xff] %v2217_v13  ;;  %v2238_v15 = vadd.f32 %v2988_v14, %v3623_v36 }
 0x3ac   : > { %v2229_v16 = vpop.f32.mrf.mxu1 }
 0x3ad   : > { %2330 = vst [vmem:[%s3626_s22 + $0x1b0] sm:$0xff] %v2238_v15  ;;  %v2230_v17 = vadd.f32 %v3623_v36, %v2229_v16 }
 0x3ae   : > { %v2989_v18 = vpop.f32.mrf.mxu1 }
 0x3af   : > { %2328 = vst [vmem:[%s3626_s22 + $0x1a0] sm:$0xff] %v2230_v17  ;;  %v2241_v19 = vadd.f32 %v2989_v18, %v3623_v36 }
 0x3b0   : > { %v2232_v20 = vpop.f32.mrf.mxu1 }
 0x3b1   : > { %2331 = vst [vmem:[%s3626_s22 + $0x1b8] sm:$0xff] %v2241_v19  ;;  %v2233_v21 = vadd.f32 %v3623_v36, %v2232_v20 }
 0x3b2   : > { %v2992_v22 = vpop.f32.mrf.mxu1 }
 0x3b3   : > { %2329 = vst [vmem:[%s3626_s22 + $0x1a8] sm:$0xff] %v2233_v21  ;;  %v2254_v46 = vadd.f32 %v2992_v22, %v3623_v36 }
 0x3b4   : > { %v2245_v23 = vpop.f32.mrf.mxu1 }
 0x3b5   : > { %2334 = vst [vmem:[%s3626_s22 + $0x1d0] sm:$0xff] %v2254_v46  ;;  %v2246_v25 = vadd.f32 %v3623_v36, %v2245_v23 }
 0x3b6   : > { %v2993_v26 = vpop.f32.mrf.mxu1 }
 0x3b7   : > { %2332 = vst [vmem:[%s3626_s22 + $0x1c0] sm:$0xff] %v2246_v25  ;;  %v2257_v27 = vadd.f32 %v2993_v26, %v3623_v36 }
 0x3b8   : > { %v2248_v28 = vpop.f32.mrf.mxu1 }
 0x3b9   : > { %2335 = vst [vmem:[%s3626_s22 + $0x1d8] sm:$0xff] %v2257_v27  ;;  %v2249_v29 = vadd.f32 %v3623_v36, %v2248_v28 }
 0x3ba   : > { %v2996_v30 = vpop.f32.mrf.mxu1 }
 0x3bb   : > { %2333 = vst [vmem:[%s3626_s22 + $0x1c8] sm:$0xff] %v2249_v29  ;;  %v2270_v31 = vadd.f32 %v2996_v30, %v3623_v36 }
 0x3bc   : > { %v2261_v32 = vpop.f32.mrf.mxu1 }
 0x3bd   : > { %2338 = vst [vmem:[%s3626_s22 + $0x1f0] sm:$0xff] %v2270_v31  ;;  %v2262_v33 = vadd.f32 %v3623_v36, %v2261_v32 }
 0x3be   : > { %v2997_v34 = vpop.f32.mrf.mxu1 }
 0x3bf   : > { %2336 = vst [vmem:[%s3626_s22 + $0x1e0] sm:$0xff] %v2262_v33  ;;  %v2273_v35 = vadd.f32 %v2997_v34, %v3623_v36 }
 0x3c0   : > { %v2264_v37 = vpop.f32.mrf.mxu1 }
 0x3c1   : > { %2339 = vst [vmem:[%s3626_s22 + $0x1f8] sm:$0xff] %v2273_v35  ;;  %v2265_v38 = vadd.f32 %v3623_v36, %v2264_v37 }
 0x3c3   : > { %2337 = vst [vmem:[%s3626_s22 + $0x1e8] sm:$0xff] %v2265_v38 }
 0x3c4   : > { %3125 = shalt.err (!%p3122_p3)
}
 0x3c5   : > { %s3126_s18 = scalar_lea.hbm %s3757_s14, 8192  ;;  %s3130_s21 = scalar_lea.hbm %s3813_s7, 16384 }
 0x3c6   : > { %p3127_p4 = scmp.ne.s32.totalorder %s3757_s14, %s3126_s18  ;;  %p3131_p9 = scmp.lt.s32.totalorder %s3757_s14, %s3813_s7 }
 0x3c7   : > { %p3132_p10 = scmp.lt.s32.totalorder %s3130_s21, %s3126_s18 }
 0x3c8   : > { %p3128_p7 = pnand %p3127_p4, %p3255_p5 }
 0x3c9   : > { %p3133_p11 = por %p3132_p10, %p3131_p9 }
 0x3ca   : > { %p3129_p8 = pneg %p3128_p7 }
 0x3cc   : > { %p3134_p12 = pnand %p3133_p11, %p3129_p8 }
 0x3ce   : > { %3137 = shalt.err (!%p3134_p12)
}
 0x3cf   : > { %s3175_s9 = smov 128   ;;  %s3176_s13 = smov 8  }
 0x3d0   : > { %3014 = dma.vmem_to_hbm [thread:$0]  (%p3255_p5), %s3759_s8, 8192, %s3757_s14, %s3766_s28, %s3175_s9, %s3175_s9, %s3176_s13  }
 0x3d1 PF: > { %p3020_p13 = scmp.ge.s32.totalorder %s3172_s27, 2  ;;  %s2369_s23 = sand.u32 1, %s3160_s24  }
 0x3d2   : > { %s2370_s15 = scalar_lea.sflag [#allocation3], %s2369_s23 }
 0x3d3   : > { %p3017_p0 = pnand %p3020_p13, %p3259_p6 }
 0x3d5   : > { %p3018_p1 = pneg %p3017_p0 }
 0x3d7   : > { %3155 = dma.done.wait (%p3018_p1), %s2370_s15, 8192  }
 0x3d8   : > { %3157 = vsyncadd (%p3018_p1), %s2370_s15, 4294959104  ;;  %p17_p2 = scmp.ge.s32.totalorder %s3242_s30, 4   ;;  %s3816_s24 = smov %s3164_s25 }
 0x3d9   : > { %s3817_s25 = smov %s3168_s26  ;;  %s3818_s26 = smov %s3253_s10 }
 0x3da   : > { %s3819_s27 = smov %s3242_s30  ;;  %19 = sbr.rel (!%p17_p2) target bundleno = 3 (0x3), region = 85 }
 0x3df   :  { %2375 = vsyncpa [#allocation3], 1 }
 0x3e0   :  { %2377 = vsyncpa [#allocation3 + $0x1], 1 }

</bundles_post_ra>
